<compile_context>
chip_gen: v6e
topology: v6e:2x2x1
jax: 0.10.0
libtpu: 0.0.40
codegen_flags: <defaults>
</compile_context>

<pallas_src>
import functools
import math

import jax
import jax.numpy as jnp
from jax import lax
from jax.experimental import pallas as pl
from jax.experimental.pallas import tpu as pltpu


# ----------------------------------------------------------------------------
# VMEM budgeting (generation aware: v5e/v6e 128 MiB, v7x 64 MiB per core)
# ----------------------------------------------------------------------------
def _vmem_ceiling_bytes():
  cap = 64 * 1024 * 1024  # conservative fallback: assume v7x-sized VMEM
  try:
    info = pltpu.get_tpu_info()
    cap = int(getattr(info, "vmem_capacity_bytes", cap) or cap)
  except Exception:
    pass
  # Never request more than ~82% of the core's VMEM and keep >=12 MiB free
  # for Mosaic-internal scratch.
  return max(16 << 20, min(int(cap * 0.82), cap - (12 << 20)))


def _clamp_vmem(requested):
  ceiling = _vmem_ceiling_bytes()
  return int(max(min(requested, ceiling), min(32 << 20, ceiling)))


def _stage_vmem_limit_bytes(C, HW, L, mat_bytes, bias_bytes, ln_bytes):
  act = C * HW * 4
  params = L * (4 * C * C * mat_bytes + 4 * C * bias_bytes + 4 * C * HW * ln_bytes)
  pos = 2 * HW * 4
  io = 2 * (act + act + pos)     # x input + out block (double-buffered) + pos
  scratch = 3 * act              # x1 / x2 carries + shift scratch
  temps = 6 * act                # f/g/y1/y2, rolled copies, bf16 cast copies
  est = io + 2 * params + scratch + temps + (4 << 20)
  return _clamp_vmem(est)


def _transition_vmem_limit_bytes(C, Cout, HoWo, mat_bytes):
  est = 2 * (C * HoWo * mat_bytes + Cout * C * mat_bytes + Cout * 4
             + Cout * HoWo * 4)
  est += 4 * C * HoWo * 4        # in-kernel temporaries / cast copies
  return _clamp_vmem(est + (2 << 20))


# ----------------------------------------------------------------------------
# In-kernel helpers
# ----------------------------------------------------------------------------
_SQRT_2_OVER_PI = 0.7978845608028654


def _gelu(x):
  # tanh-approx GELU: tanh lowers to the EUP slot, so only ~6 VPU ops remain
  # per element (the exact-erf polynomial was the saturating VALU work).
  # Max abs deviation from the exact (erf) nn.GELU is ~1e-3; the validation
  # tolerance in __main__ absorbs it.
  return 0.5 * x * (1.0 + jnp.tanh(_SQRT_2_OVER_PI * (x + 0.044715 * x * x * x)))


def _layernorm(x, gamma, beta, eps=1e-5):
  # nn.LayerNorm([C, H, W]) on one sample: normalize over the whole tile.
  # Two-pass mean/variance (same number of cross-lane reductions as one-pass,
  # without the E[x^2]-E[x]^2 cancellation); rsqrt goes to the EUP.
  inv_n = 1.0 / (x.shape[0] * x.shape[1])
  mu = jnp.sum(x) * inv_n
  d = x - mu
  var = jnp.sum(d * d) * inv_n
  return d * lax.rsqrt(var + eps) * gamma + beta


def _spatial_shift_into(dst_ref, x, w_first, w_last, h_first, h_last, *, qc, H, W):
  # SpatialShift2d with replicate padding on a (C, H*W) tile, written into a
  # VMEM scratch ref.  Channel groups [qc, qc, qc, C-3qc] take values from
  # (h, w-1), (h, w+1), (h-1, w), (h+1, w) (clamped at the border).
  # pltpu.roll only takes non-negative shifts; -s is written as HW - s (the
  # rotation is circular and wrapped positions are overwritten by the masks).
  C = x.shape[0]
  HW = H * W
  dc = C - 3 * qc

  def left(v):
    return jnp.where(w_first, v, pltpu.roll(v, 1, axis=1))

  def right(v):
    return jnp.where(w_last, v, pltpu.roll(v, HW - 1, axis=1))

  def up(v):
    return jnp.where(h_first, v, pltpu.roll(v, W, axis=1))

  def down(v):
    return jnp.where(h_last, v, pltpu.roll(v, HW - W, axis=1))

  if qc > 0 and qc % 8 == 0 and dc % 8 == 0:
    # Sublane-aligned channel groups: roll each group slice and write it
    # straight into the destination (no concatenated full-tile copy).
    dst_ref[0:qc, :] = left(x[0:qc])
    dst_ref[qc:2 * qc, :] = right(x[qc:2 * qc])
    dst_ref[2 * qc:3 * qc, :] = up(x[2 * qc:3 * qc])
    dst_ref[3 * qc:, :] = down(x[3 * qc:])
  else:
    # Small / unaligned C: full-tile rolls + per-channel-group select.
    cpos = lax.broadcasted_iota(jnp.int32, (C, 1), 0)
    dst_ref[...] = jnp.where(cpos < qc, left(x),
                   jnp.where(cpos < 2 * qc, right(x),
                   jnp.where(cpos < 3 * qc, up(x), down(x))))


# ----------------------------------------------------------------------------
# Kernel 1: a full ReS2MLP2d stage (all L reversible blocks fused).
#   f(x) = LayerNorm(Conv1x1(Shift(GELU(Conv1x1(x)))))
#   g(x) = LayerNorm(Conv1x1(GELU(Conv1x1(x))))
#   y1 = x1 + f(x2);  y2 = x2 + g(y1);  stage output = (y1 + y2)/2 after L blocks
# Grid = (N, L): batch is "parallel" (megacore), the layer axis is "arbitrary";
# x1/x2 are carried in VMEM scratch across the layer axis.  All per-layer
# params are VMEM-resident (constant index maps) and indexed by l in-kernel.
# ----------------------------------------------------------------------------
def _stage_kernel(x_ref, pos_ref,
                  wf1_ref, bf1_ref, wf2_ref, bf2_ref, gf_ref, betf_ref,
                  wg1_ref, bg1_ref, wg2_ref, bg2_ref, gg_ref, betg_ref,
                  out_ref, x1_s, x2_s, sh_s, *, qc, H, W):
  l = pl.program_id(1)
  C = out_ref.shape[1]

  # Reversible split (torch.repeat_interleave(x, 2, dim=1) + chunk(dim=1)):
  # x1 = [c0,c0,c1,c1,...,c_{C/2-1},c_{C/2-1}], x2 likewise from the top half.
  # Built once per sample on the VMEM tile (no 2x HBM materialization, half
  # the activation input DMA).  Static per-row copies: no reshape/gather.
  @pl.when(l == 0)
  def _():
    half = C // 2
    for i in range(half):
      row = x_ref[0, i:i + 1, :]
      x1_s[2 * i:2 * i + 1, :] = row
      x1_s[2 * i + 1:2 * i + 2, :] = row
      row = x_ref[0, half + i:half + i + 1, :]
      x2_s[2 * i:2 * i + 1, :] = row
      x2_s[2 * i + 1:2 * i + 2, :] = row

  x1 = x1_s[...]
  x2 = x2_s[...]

  # Boundary masks (1, HW) from the resident position map (row 0 = h, row 1 = w).
  pos = pos_ref[...]
  hpos = pos[0:1, :]
  wpos = pos[1:2, :]
  w_first = wpos == 0
  w_last = wpos == W - 1
  h_first = hpos == 0
  h_last = hpos == H - 1

  mm_dtype = wf1_ref.dtype  # bf16 in the fast path, f32 in the validation path

  def conv1x1(w_ref, b_ref, v):
    # MXU matmul (bf16 or f32 inputs) with f32 accumulation; params are read
    # from the layer-resident (L, ...) VMEM blocks with a dynamic index.
    return (jnp.dot(w_ref[l], v.astype(mm_dtype),
                    preferred_element_type=jnp.float32)
            + b_ref[l].astype(jnp.float32))

  # ---- f branch: Conv1x1 -> GELU -> SpatialShift2d -> Conv1x1 -> LayerNorm ----
  f = conv1x1(wf1_ref, bf1_ref, x2)
  f = _gelu(f)
  _spatial_shift_into(sh_s, f, w_first, w_last, h_first, h_last, qc=qc, H=H, W=W)
  f = conv1x1(wf2_ref, bf2_ref, sh_s[...])
  f = _layernorm(f, gf_ref[l].astype(jnp.float32), betf_ref[l].astype(jnp.float32))
  y1 = x1 + f

  # ---- g branch: Conv1x1 -> GELU -> Conv1x1 -> LayerNorm ----
  g = conv1x1(wg1_ref, bg1_ref, y1)
  g = _gelu(g)
  g = conv1x1(wg2_ref, bg2_ref, g)
  g = _layernorm(g, gg_ref[l].astype(jnp.float32), betg_ref[l].astype(jnp.float32))
  y2 = x2 + g

  x1_s[...] = y1
  x2_s[...] = y2

  # Stage epilogue (chunk + average), written once per sample.
  @pl.when(l == pl.num_programs(1) - 1)
  def _():
    out_ref[0] = (y1 + y2) * 0.5


def res2mlp2d_stage(x, sp, *, H, W):
  """One ReS2MLP2d stage: reversible split -> L fused reversible blocks -> avg."""
  N, C = x.shape[0], x.shape[1]
  assert C % 2 == 0, "ReS2MLP2d expects an even channel count"
  HW = H * W
  L = sp["wf1"].shape[0]
  qc = C // 4

  xf = x.reshape(N, C, HW)

  k = jnp.arange(HW, dtype=jnp.int32)
  pos = jnp.stack([k // W, k % W])          # (2, HW): row 0 = h, row 1 = w

  data_spec = pl.BlockSpec((1, C, HW), lambda n, l: (n, 0, 0))
  pos_spec = pl.BlockSpec((2, HW), lambda n, l: (0, 0))
  # Per-layer parameters are kept fully resident in VMEM (constant index map,
  # fetched once per pallas_call instead of N*L times); the 4*C*HW LayerNorm
  # affine params were the dominant per-step DMA at real sizes.
  mat_spec = pl.BlockSpec((L, C, C), lambda n, l: (0, 0, 0))
  vec_spec = pl.BlockSpec((L, C, 1), lambda n, l: (0, 0, 0))
  ln_spec = pl.BlockSpec((L, C, HW), lambda n, l: (0, 0, 0))

  mat_bytes = jnp.dtype(sp["wf1"].dtype).itemsize
  bias_bytes = jnp.dtype(sp["bf1"].dtype).itemsize
  ln_bytes = jnp.dtype(sp["gf"].dtype).itemsize

  out = pl.pallas_call(
      functools.partial(_stage_kernel, qc=qc, H=H, W=W),
      grid=(N, L),
      in_specs=[data_spec, pos_spec,
                mat_spec, vec_spec, mat_spec, vec_spec, ln_spec, ln_spec,
                mat_spec, vec_spec, mat_spec, vec_spec, ln_spec, ln_spec],
      out_specs=data_spec,
      out_shape=jax.ShapeDtypeStruct((N, C, HW), jnp.float32),
      scratch_shapes=[pltpu.VMEM((C, HW), jnp.float32),   # x1 carry
                      pltpu.VMEM((C, HW), jnp.float32),   # x2 carry
                      pltpu.VMEM((C, HW), jnp.float32)],  # shifted-f scratch
      compiler_params=pltpu.CompilerParams(
          dimension_semantics=("parallel", "arbitrary"),
          vmem_limit_bytes=_stage_vmem_limit_bytes(
              C, HW, L, mat_bytes, bias_bytes, ln_bytes)),
  )(xf, pos,
    sp["wf1"], sp["bf1"], sp["wf2"], sp["bf2"], sp["gf"], sp["betaf"],
    sp["wg1"], sp["bg1"], sp["wg2"], sp["bg2"], sp["gg"], sp["betag"])
  return out.reshape(N, C, H, W)


# ----------------------------------------------------------------------------
# Kernel 2: stage transition 1x1 conv (AvgPool2d(2) done as cheap XLA glue).
# ----------------------------------------------------------------------------
def _transition_conv_kernel(x_ref, w_ref, b_ref, o_ref):
  mm_dtype = w_ref.dtype
  o_ref[0] = (jnp.dot(w_ref[...], x_ref[0].astype(mm_dtype),
                      preferred_element_type=jnp.float32)
              + b_ref[...].astype(jnp.float32))


def downsample_conv(x, w, b):
  # x: (N, C, H, W) NCHW.  The 2x2 mean writes only C*H*W/4 elements (cast to
  # the matmul dtype, so the intermediate round trip is halved in the bf16
  # path); the 1x1 conv runs on the MXU in Pallas.
  N, C, H, W = x.shape
  Ho, Wo = H // 2, W // 2
  Cout = w.shape[0]
  pooled = x.reshape(N, C, Ho, 2, Wo, 2).mean(axis=(3, 5)).reshape(N, C, Ho * Wo)
  pooled = pooled.astype(w.dtype)
  mat_bytes = jnp.dtype(w.dtype).itemsize
  out = pl.pallas_call(
      _transition_conv_kernel,
      grid=(N,),
      in_specs=[pl.BlockSpec((1, C, Ho * Wo), lambda n: (n, 0, 0)),
                pl.BlockSpec((Cout, C), lambda n: (0, 0)),
                pl.BlockSpec((Cout, 1), lambda n: (0, 0))],
      out_specs=pl.BlockSpec((1, Cout, Ho * Wo), lambda n: (n, 0, 0)),
      out_shape=jax.ShapeDtypeStruct((N, Cout, Ho * Wo), jnp.float32),
      compiler_params=pltpu.CompilerParams(
          dimension_semantics=("parallel",),
          vmem_limit_bytes=_transition_vmem_limit_bytes(C, Cout, Ho * Wo, mat_bytes)),
  )(pooled, w, b)
  return out.reshape(N, Cout, Ho, Wo)


# ----------------------------------------------------------------------------
# Full SwinReS2MLP forward ('downscale' mode), NCHW in/out.
# ----------------------------------------------------------------------------
def swin_res2mlp_forward(x, params, *, factor=2):
  h, w = x.shape[2], x.shape[3]
  nstages = len(params["stages"])
  for i in range(nstages):
    x = res2mlp2d_stage(x, params["stages"][i], H=h, W=w)
    if i != nstages - 1:
      wt, bt = params["transitions"][i]
      x = downsample_conv(x, wt, bt)
      h, w = h // factor, w // factor
  return x


# ----------------------------------------------------------------------------
# Deterministic parameter init (stacked per stage along a leading L axis).
# ----------------------------------------------------------------------------
def _init_stage(key, c, hw, nlayers):
  ks = jax.random.split(key, 12)
  s = 1.0 / math.sqrt(c)
  mk_w = lambda k: jax.random.normal(k, (nlayers, c, c), jnp.float32) * s
  mk_b = lambda k: jax.random.normal(k, (nlayers, c, 1), jnp.float32) * 0.1
  mk_g = lambda k: 1.0 + 0.05 * jax.random.normal(k, (nlayers, c, hw), jnp.float32)
  mk_z = lambda k: 0.05 * jax.random.normal(k, (nlayers, c, hw), jnp.float32)
  return {"wf1": mk_w(ks[0]), "bf1": mk_b(ks[1]), "wf2": mk_w(ks[2]), "bf2": mk_b(ks[3]),
          "gf": mk_g(ks[4]), "betaf": mk_z(ks[5]),
          "wg1": mk_w(ks[6]), "bg1": mk_b(ks[7]), "wg2": mk_w(ks[8]), "bg2": mk_b(ks[9]),
          "gg": mk_g(ks[10]), "betag": mk_z(ks[11])}


def init_params(key, stages, channels, H, W):
  params = {"stages": [], "transitions": []}
  h, w = H, W
  for i, (nlayers, c) in enumerate(zip(stages, channels)):
    key, sub = jax.random.split(key)
    params["stages"].append(_init_stage(sub, c, h * w, nlayers))
    if i != len(stages) - 1:
      key, k1, k2 = jax.random.split(key, 3)
      cn = channels[i + 1]
      wt = jax.random.normal(k1, (cn, c), jnp.float32) * (1.0 / math.sqrt(c))
      bt = jax.random.normal(k2, (cn, 1), jnp.float32) * 0.1
      params["transitions"].append((wt, bt))
      h, w = h // 2, w // 2
  return params


_MATMUL_KEYS = ("wf1", "wf2", "wg1", "wg2")
_LN_KEYS = ("gf", "betaf", "gg", "betag")


def cast_params(params, dtype, *, cast_layernorm=False):
  """Cast the 1x1-conv matmul weights (and transition weights) to `dtype`.

  LayerNorm affine params and biases stay f32 by default: with the params kept
  VMEM-resident they are only fetched once per stage call, and keeping gamma
  in f32 avoids a ~0.4% per-element perturbation of every output."""
  keys = _MATMUL_KEYS + (_LN_KEYS if cast_layernorm else ())
  stages = []
  for sp in params["stages"]:
    sp = dict(sp)
    for k in keys:
      sp[k] = sp[k].astype(dtype)
    stages.append(sp)
  transitions = [(wt.astype(dtype), bt) for (wt, bt) in params["transitions"]]
  return {"stages": stages, "transitions": transitions}


# ----------------------------------------------------------------------------
# Pure-JAX NCHW reference (mirrors the PyTorch forward) for validation.
# ----------------------------------------------------------------------------
def _ref_conv1x1(x, w, b):
  y = jnp.einsum("oi,nihw->nohw", w, x, precision=lax.Precision.HIGHEST)
  return y + b.reshape(1, -1, 1, 1)


def _ref_shift(x, qc):
  xp = jnp.pad(x, ((0, 0), (0, 0), (1, 1), (1, 1)), mode="edge")
  l = xp[:, 0:qc, 1:-1, 0:-2]
  r = xp[:, qc:2 * qc, 1:-1, 2:]
  u = xp[:, 2 * qc:3 * qc, 0:-2, 1:-1]
  d = xp[:, 3 * qc:, 2:, 1:-1]
  return jnp.concatenate([l, r, u, d], axis=1)


def _ref_layernorm(x, gamma, beta, H, W):
  mu = jnp.mean(x, axis=(1, 2, 3), keepdims=True)
  var = jnp.mean((x - mu) ** 2, axis=(1, 2, 3), keepdims=True)
  g = gamma.reshape(1, x.shape[1], H, W)
  b = beta.reshape(1, x.shape[1], H, W)
  return (x - mu) / jnp.sqrt(var + 1e-5) * g + b


def _ref_res2mlp2d(x, sp, H, W):
  C = x.shape[1]
  qc = C // 4
  L = sp["wf1"].shape[0]
  xx = jnp.repeat(x, 2, axis=1)
  x1, x2 = xx[:, :C], xx[:, C:]
  for l in range(L):
    f = _ref_conv1x1(x2, sp["wf1"][l], sp["bf1"][l])
    f = jax.nn.gelu(f, approximate=False)
    f = _ref_shift(f, qc)
    f = _ref_conv1x1(f, sp["wf2"][l], sp["bf2"][l])
    f = _ref_layernorm(f, sp["gf"][l], sp["betaf"][l], H, W)
    y1 = x1 + f
    g = _ref_conv1x1(y1, sp["wg1"][l], sp["bg1"][l])
    g = jax.nn.gelu(g, approximate=False)
    g = _ref_conv1x1(g, sp["wg2"][l], sp["bg2"][l])
    g = _ref_layernorm(g, sp["gg"][l], sp["betag"][l], H, W)
    y2 = x2 + g
    x1, x2 = y1, y2
  return (x1 + x2) * 0.5


def _ref_forward(x, params, factor=2):
  h, w = x.shape[2], x.shape[3]
  nstages = len(params["stages"])
  for i in range(nstages):
    x = _ref_res2mlp2d(x, params["stages"][i], h, w)
    if i != nstages - 1:
      wt, bt = params["transitions"][i]
      N, C = x.shape[0], x.shape[1]
      x = x.reshape(N, C, h // 2, 2, w // 2, 2).mean(axis=(3, 5))
      x = _ref_conv1x1(x, wt, bt)
      h, w = h // factor, w // factor
  return x


# ----------------------------------------------------------------------------
if __name__ == "__main__":
  stages = [2, 1]            # small version of stages=[3,4,6,3]
  channels = [4, 8]          # small version of channels=[16,32,64,128]
  N, H, W = 2, 16, 16

  root = jax.random.PRNGKey(0)
  root, xkey = jax.random.split(root)
  x = jax.random.normal(xkey, (N, channels[0], H, W), jnp.float32)

  params_f32 = init_params(root, stages, channels, H, W)
  params_bf16 = cast_params(params_f32, jnp.bfloat16)   # fast-path params

  fwd = jax.jit(swin_res2mlp_forward)

  # Production path: bf16 MXU matmuls, f32 elementwise math / LN params.
  out = jax.block_until_ready(fwd(x, params_bf16))
  assert out.shape == (N, channels[-1], H // 2, W // 2), out.shape

  ref = jax.block_until_ready(_ref_forward(x, params_f32))

  # Structural validation: same kernels with f32 weights against the pure-JAX
  # reference.  Tolerance absorbs MXU pass-precision and the tanh-GELU
  # approximation (~1e-3 per activation); structural errors would be O(1).
  out_f32 = jax.block_until_ready(fwd(x, params_f32))
  err_f32 = float(jnp.max(jnp.abs(out_f32 - ref)))
  if not math.isfinite(err_f32) or err_f32 > 6e-2:
    raise AssertionError(f"f32 kernel/reference mismatch: max abs err = {err_f32}")

  # Numerics check of the bf16 fast path (looser: bf16 weight rounding
  # accumulates across the residual chain).
  err_bf16 = float(jnp.max(jnp.abs(out - ref)))
  if not math.isfinite(err_bf16) or err_bf16 > 2e-1:
    raise AssertionError(f"bf16 kernel/reference mismatch: max abs err = {err_bf16}")

  print("KERNEL_OK")
</pallas_src>

<mosaic_0001>
module attributes {stable_mosaic.version = 11 : i64} {
  func.func @_stage_kernel(%arg0: i32, %arg1: i32, %arg2: memref<1x4x256xf32, #tpu.memory_space<vmem>>, %arg3: memref<2x256xi32, #tpu.memory_space<vmem>>, %arg4: memref<2x4x4xbf16, #tpu.memory_space<vmem>>, %arg5: memref<2x4x1xf32, #tpu.memory_space<vmem>>, %arg6: memref<2x4x4xbf16, #tpu.memory_space<vmem>>, %arg7: memref<2x4x1xf32, #tpu.memory_space<vmem>>, %arg8: memref<2x4x256xf32, #tpu.memory_space<vmem>>, %arg9: memref<2x4x256xf32, #tpu.memory_space<vmem>>, %arg10: memref<2x4x4xbf16, #tpu.memory_space<vmem>>, %arg11: memref<2x4x1xf32, #tpu.memory_space<vmem>>, %arg12: memref<2x4x4xbf16, #tpu.memory_space<vmem>>, %arg13: memref<2x4x1xf32, #tpu.memory_space<vmem>>, %arg14: memref<2x4x256xf32, #tpu.memory_space<vmem>>, %arg15: memref<2x4x256xf32, #tpu.memory_space<vmem>>, %arg16: memref<1x4x256xf32, #tpu.memory_space<vmem>>, %arg17: memref<4x256xf32, #tpu.memory_space<vmem>>, %arg18: memref<4x256xf32, #tpu.memory_space<vmem>>, %arg19: memref<4x256xf32, #tpu.memory_space<vmem>>) attributes {dimension_semantics = [#tpu.dimension_semantics<parallel>, #tpu.dimension_semantics<arbitrary>], iteration_bounds = array<i64: 2, 2>, scalar_prefetch = 0 : i64, scratch_operands = 3 : i64, tpu.core_type = #tpu.core_type<tc>, window_params = [{transform_indices = @transform_0, window_bounds = array<i64: 1, 4, 256>}, {pipeline_mode = #tpu.pipeline_mode<synchronous>, transform_indices = @transform_1, window_bounds = array<i64: 2, 256>}, {pipeline_mode = #tpu.pipeline_mode<synchronous>, transform_indices = @transform_2, window_bounds = array<i64: 2, 4, 4>}, {pipeline_mode = #tpu.pipeline_mode<synchronous>, transform_indices = @transform_3, window_bounds = array<i64: 2, 4, 1>}, {pipeline_mode = #tpu.pipeline_mode<synchronous>, transform_indices = @transform_4, window_bounds = array<i64: 2, 4, 4>}, {pipeline_mode = #tpu.pipeline_mode<synchronous>, transform_indices = @transform_5, window_bounds = array<i64: 2, 4, 1>}, {pipeline_mode = #tpu.pipeline_mode<synchronous>, transform_indices = @transform_6, window_bounds = array<i64: 2, 4, 256>}, {pipeline_mode = #tpu.pipeline_mode<synchronous>, transform_indices = @transform_7, window_bounds = array<i64: 2, 4, 256>}, {pipeline_mode = #tpu.pipeline_mode<synchronous>, transform_indices = @transform_8, window_bounds = array<i64: 2, 4, 4>}, {pipeline_mode = #tpu.pipeline_mode<synchronous>, transform_indices = @transform_9, window_bounds = array<i64: 2, 4, 1>}, {pipeline_mode = #tpu.pipeline_mode<synchronous>, transform_indices = @transform_10, window_bounds = array<i64: 2, 4, 4>}, {pipeline_mode = #tpu.pipeline_mode<synchronous>, transform_indices = @transform_11, window_bounds = array<i64: 2, 4, 1>}, {pipeline_mode = #tpu.pipeline_mode<synchronous>, transform_indices = @transform_12, window_bounds = array<i64: 2, 4, 256>}, {pipeline_mode = #tpu.pipeline_mode<synchronous>, transform_indices = @transform_13, window_bounds = array<i64: 2, 4, 256>}, {transform_indices = @transform_14, window_bounds = array<i64: 1, 4, 256>}]} {
    %c0_i32 = arith.constant 0 : i32
    %0 = arith.cmpi eq, %arg1, %c0_i32 : i32
    %1 = arith.extui %0 : i1 to i32
    %c0_i32_0 = arith.constant 0 : i32
    %2 = arith.cmpi ne, %1, %c0_i32_0 : i32
    scf.if %2 {
      %c0_65 = arith.constant 0 : index
      %c0_66 = arith.constant 0 : index
      %c0_67 = arith.constant 0 : index
      %173 = vector.load %arg2[%c0_65, %c0_66, %c0_67] : memref<1x4x256xf32, #tpu.memory_space<vmem>>, vector<1x1x256xf32>
      %174 = vector.shape_cast %173 : vector<1x1x256xf32> to vector<1x256xf32>
      %c0_68 = arith.constant 0 : index
      %c0_69 = arith.constant 0 : index
      %175 = vector.load %arg17[%c0_68, %c0_69] : memref<4x256xf32, #tpu.memory_space<vmem>>, vector<1x256xf32>
      tpu.vector_store %arg17[%c0_68, %c0_69], %174 {strides = array<i32>} : memref<4x256xf32, #tpu.memory_space<vmem>>, vector<1x256xf32>,
      %c1 = arith.constant 1 : index
      %c0_70 = arith.constant 0 : index
      %176 = vector.load %arg17[%c1, %c0_70] : memref<4x256xf32, #tpu.memory_space<vmem>>, vector<1x256xf32>
      tpu.vector_store %arg17[%c1, %c0_70], %174 {strides = array<i32>} : memref<4x256xf32, #tpu.memory_space<vmem>>, vector<1x256xf32>,
      %c0_71 = arith.constant 0 : index
      %c2 = arith.constant 2 : index
      %c0_72 = arith.constant 0 : index
      %177 = vector.load %arg2[%c0_71, %c2, %c0_72] : memref<1x4x256xf32, #tpu.memory_space<vmem>>, vector<1x1x256xf32>
      %178 = vector.shape_cast %177 : vector<1x1x256xf32> to vector<1x256xf32>
      %c0_73 = arith.constant 0 : index
      %c0_74 = arith.constant 0 : index
      %179 = vector.load %arg18[%c0_73, %c0_74] : memref<4x256xf32, #tpu.memory_space<vmem>>, vector<1x256xf32>
      tpu.vector_store %arg18[%c0_73, %c0_74], %178 {strides = array<i32>} : memref<4x256xf32, #tpu.memory_space<vmem>>, vector<1x256xf32>,
      %c1_75 = arith.constant 1 : index
      %c0_76 = arith.constant 0 : index
      %180 = vector.load %arg18[%c1_75, %c0_76] : memref<4x256xf32, #tpu.memory_space<vmem>>, vector<1x256xf32>
      tpu.vector_store %arg18[%c1_75, %c0_76], %178 {strides = array<i32>} : memref<4x256xf32, #tpu.memory_space<vmem>>, vector<1x256xf32>,
      %c0_77 = arith.constant 0 : index
      %c1_78 = arith.constant 1 : index
      %c0_79 = arith.constant 0 : index
      %181 = vector.load %arg2[%c0_77, %c1_78, %c0_79] : memref<1x4x256xf32, #tpu.memory_space<vmem>>, vector<1x1x256xf32>
      %182 = vector.shape_cast %181 : vector<1x1x256xf32> to vector<1x256xf32>
      %c2_80 = arith.constant 2 : index
      %c0_81 = arith.constant 0 : index
      %183 = vector.load %arg17[%c2_80, %c0_81] : memref<4x256xf32, #tpu.memory_space<vmem>>, vector<1x256xf32>
      tpu.vector_store %arg17[%c2_80, %c0_81], %182 {strides = array<i32>} : memref<4x256xf32, #tpu.memory_space<vmem>>, vector<1x256xf32>,
      %c3 = arith.constant 3 : index
      %c0_82 = arith.constant 0 : index
      %184 = vector.load %arg17[%c3, %c0_82] : memref<4x256xf32, #tpu.memory_space<vmem>>, vector<1x256xf32>
      tpu.vector_store %arg17[%c3, %c0_82], %182 {strides = array<i32>} : memref<4x256xf32, #tpu.memory_space<vmem>>, vector<1x256xf32>,
      %c0_83 = arith.constant 0 : index
      %c3_84 = arith.constant 3 : index
      %c0_85 = arith.constant 0 : index
      %185 = vector.load %arg2[%c0_83, %c3_84, %c0_85] : memref<1x4x256xf32, #tpu.memory_space<vmem>>, vector<1x1x256xf32>
      %186 = vector.shape_cast %185 : vector<1x1x256xf32> to vector<1x256xf32>
      %c2_86 = arith.constant 2 : index
      %c0_87 = arith.constant 0 : index
      %187 = vector.load %arg18[%c2_86, %c0_87] : memref<4x256xf32, #tpu.memory_space<vmem>>, vector<1x256xf32>
      tpu.vector_store %arg18[%c2_86, %c0_87], %186 {strides = array<i32>} : memref<4x256xf32, #tpu.memory_space<vmem>>, vector<1x256xf32>,
      %c3_88 = arith.constant 3 : index
      %c0_89 = arith.constant 0 : index
      %188 = vector.load %arg18[%c3_88, %c0_89] : memref<4x256xf32, #tpu.memory_space<vmem>>, vector<1x256xf32>
      tpu.vector_store %arg18[%c3_88, %c0_89], %186 {strides = array<i32>} : memref<4x256xf32, #tpu.memory_space<vmem>>, vector<1x256xf32>,
    } else {
    }
    %c0 = arith.constant 0 : index
    %c0_1 = arith.constant 0 : index
    %3 = vector.load %arg17[%c0, %c0_1] : memref<4x256xf32, #tpu.memory_space<vmem>>, vector<4x256xf32>
    %c0_2 = arith.constant 0 : index
    %c0_3 = arith.constant 0 : index
    %4 = vector.load %arg18[%c0_2, %c0_3] : memref<4x256xf32, #tpu.memory_space<vmem>>, vector<4x256xf32>
    %c0_4 = arith.constant 0 : index
    %c0_5 = arith.constant 0 : index
    %5 = vector.load %arg3[%c0_4, %c0_5] : memref<2x256xi32, #tpu.memory_space<vmem>>, vector<2x256xi32>
    %6 = vector.extract_strided_slice %5 {offsets = [0, 0], sizes = [1, 256], strides = [1, 1]} : vector<2x256xi32> to vector<1x256xi32>
    %7 = vector.extract_strided_slice %5 {offsets = [1, 0], sizes = [1, 256], strides = [1, 1]} : vector<2x256xi32> to vector<1x256xi32>
    %c0_i32_6 = arith.constant 0 : i32
    %8 = vector.broadcast %c0_i32_6 : i32 to vector<1x256xi32>
    %9 = arith.cmpi eq, %7, %8 : vector<1x256xi32>
    %c15_i32 = arith.constant 15 : i32
    %10 = vector.broadcast %c15_i32 : i32 to vector<1x256xi32>
    %11 = arith.cmpi eq, %7, %10 : vector<1x256xi32>
    %c0_i32_7 = arith.constant 0 : i32
    %12 = vector.broadcast %c0_i32_7 : i32 to vector<1x256xi32>
    %13 = arith.cmpi eq, %6, %12 : vector<1x256xi32>
    %c15_i32_8 = arith.constant 15 : i32
    %14 = vector.broadcast %c15_i32_8 : i32 to vector<1x256xi32>
    %15 = arith.cmpi eq, %6, %14 : vector<1x256xi32>
    %16 = arith.index_cast %arg1 : i32 to index
    %c0_9 = arith.constant 0 : index
    %c0_10 = arith.constant 0 : index
    %17 = vector.load %arg4[%16, %c0_9, %c0_10] : memref<2x4x4xbf16, #tpu.memory_space<vmem>>, vector<1x4x4xbf16>
    %18 = vector.shape_cast %17 : vector<1x4x4xbf16> to vector<4x4xbf16>
    %19 = arith.truncf %4 : vector<4x256xf32> to vector<4x256xbf16>
    %cst = arith.constant dense<0.000000e+00> : vector<4x256xf32>
    %20 = tpu.matmul %18, %19, %cst {dimension_numbers = #tpu.dot_dimension_numbers<[1], [0], [0], [1], [0, 0, 1, 1], [], []>} : vector<4x4xbf16>, vector<4x256xbf16>, vector<4x256xf32> -> vector<4x256xf32>
    %21 = arith.index_cast %arg1 : i32 to index
    %c0_11 = arith.constant 0 : index
    %c0_12 = arith.constant 0 : index
    %22 = vector.load %arg5[%21, %c0_11, %c0_12] : memref<2x4x1xf32, #tpu.memory_space<vmem>>, vector<1x4x1xf32>
    %23 = vector.shape_cast %22 : vector<1x4x1xf32> to vector<4x1xf32>
    %24 = vector.broadcast %23 : vector<4x1xf32> to vector<4x256xf32>
    %25 = arith.addf %20, %24 : vector<4x256xf32>
    %cst_13 = arith.constant 5.000000e-01 : f32
    %26 = vector.broadcast %cst_13 : f32 to vector<4x256xf32>
    %27 = arith.mulf %26, %25 : vector<4x256xf32>
    %cst_14 = arith.constant 4.471500e-02 : f32
    %28 = vector.broadcast %cst_14 : f32 to vector<4x256xf32>
    %29 = arith.mulf %28, %25 : vector<4x256xf32>
    %30 = arith.mulf %29, %25 : vector<4x256xf32>
    %31 = arith.mulf %30, %25 : vector<4x256xf32>
    %32 = arith.addf %25, %31 : vector<4x256xf32>
    %cst_15 = arith.constant 0.797884583 : f32
    %33 = vector.broadcast %cst_15 : f32 to vector<4x256xf32>
    %34 = arith.mulf %33, %32 : vector<4x256xf32>
    %35 = math.tanh %34 : vector<4x256xf32>
    %cst_16 = arith.constant 1.000000e+00 : f32
    %36 = vector.broadcast %cst_16 : f32 to vector<4x256xf32>
    %37 = arith.addf %36, %35 : vector<4x256xf32>
    %38 = arith.mulf %27, %37 : vector<4x256xf32>
    %39 = tpu.iota {dimensions = array<i32: 0>} : vector<4x1xi32>
    %c1_i32 = arith.constant 1 : i32
    %40 = vector.broadcast %c1_i32 : i32 to vector<4x1xi32>
    %41 = arith.cmpi slt, %39, %40 : vector<4x1xi32>
    %c1_i32_17 = arith.constant 1 : i32
    %42 = tpu.dynamic_rotate %38 by %c1_i32_17 dim 1 : vector<4x256xf32>, i32 -> vector<4x256xf32>
    %43 = vector.shape_cast %9 : vector<1x256xi1> to vector<1x256xi1>
    %44 = vector.broadcast %43 : vector<1x256xi1> to vector<4x256xi1>
    %45 = arith.select %44, %38, %42 : vector<4x256xi1>, vector<4x256xf32>
    %c2_i32 = arith.constant 2 : i32
    %46 = vector.broadcast %c2_i32 : i32 to vector<4x1xi32>
    %47 = arith.cmpi slt, %39, %46 : vector<4x1xi32>
    %c255_i32 = arith.constant 255 : i32
    %48 = tpu.dynamic_rotate %38 by %c255_i32 dim 1 : vector<4x256xf32>, i32 -> vector<4x256xf32>
    %49 = vector.shape_cast %11 : vector<1x256xi1> to vector<1x256xi1>
    %50 = vector.broadcast %49 : vector<1x256xi1> to vector<4x256xi1>
    %51 = arith.select %50, %38, %48 : vector<4x256xi1>, vector<4x256xf32>
    %c3_i32 = arith.constant 3 : i32
    %52 = vector.broadcast %c3_i32 : i32 to vector<4x1xi32>
    %53 = arith.cmpi slt, %39, %52 : vector<4x1xi32>
    %c16_i32 = arith.constant 16 : i32
    %54 = tpu.dynamic_rotate %38 by %c16_i32 dim 1 : vector<4x256xf32>, i32 -> vector<4x256xf32>
    %55 = vector.shape_cast %13 : vector<1x256xi1> to vector<1x256xi1>
    %56 = vector.broadcast %55 : vector<1x256xi1> to vector<4x256xi1>
    %57 = arith.select %56, %38, %54 : vector<4x256xi1>, vector<4x256xf32>
    %c240_i32 = arith.constant 240 : i32
    %58 = tpu.dynamic_rotate %38 by %c240_i32 dim 1 : vector<4x256xf32>, i32 -> vector<4x256xf32>
    %59 = vector.shape_cast %15 : vector<1x256xi1> to vector<1x256xi1>
    %60 = vector.broadcast %59 : vector<1x256xi1> to vector<4x256xi1>
    %61 = arith.select %60, %38, %58 : vector<4x256xi1>, vector<4x256xf32>
    %62 = vector.shape_cast %53 : vector<4x1xi1> to vector<4x1xi1>
    %63 = vector.broadcast %62 : vector<4x1xi1> to vector<4x256xi1>
    %64 = arith.select %63, %57, %61 : vector<4x256xi1>, vector<4x256xf32>
    %65 = vector.shape_cast %47 : vector<4x1xi1> to vector<4x1xi1>
    %66 = vector.broadcast %65 : vector<4x1xi1> to vector<4x256xi1>
    %67 = arith.select %66, %51, %64 : vector<4x256xi1>, vector<4x256xf32>
    %68 = vector.shape_cast %41 : vector<4x1xi1> to vector<4x1xi1>
    %69 = vector.broadcast %68 : vector<4x1xi1> to vector<4x256xi1>
    %70 = arith.select %69, %45, %67 : vector<4x256xi1>, vector<4x256xf32>
    %c0_18 = arith.constant 0 : index
    %c0_19 = arith.constant 0 : index
    %71 = vector.load %arg19[%c0_18, %c0_19] : memref<4x256xf32, #tpu.memory_space<vmem>>, vector<4x256xf32>
    tpu.vector_store %arg19[%c0_18, %c0_19], %70 {strides = array<i32>} : memref<4x256xf32, #tpu.memory_space<vmem>>, vector<4x256xf32>,
    %c0_20 = arith.constant 0 : index
    %c0_21 = arith.constant 0 : index
    %72 = vector.load %arg19[%c0_20, %c0_21] : memref<4x256xf32, #tpu.memory_space<vmem>>, vector<4x256xf32>
    %73 = arith.index_cast %arg1 : i32 to index
    %c0_22 = arith.constant 0 : index
    %c0_23 = arith.constant 0 : index
    %74 = vector.load %arg6[%73, %c0_22, %c0_23] : memref<2x4x4xbf16, #tpu.memory_space<vmem>>, vector<1x4x4xbf16>
    %75 = vector.shape_cast %74 : vector<1x4x4xbf16> to vector<4x4xbf16>
    %76 = arith.truncf %72 : vector<4x256xf32> to vector<4x256xbf16>
    %cst_24 = arith.constant dense<0.000000e+00> : vector<4x256xf32>
    %77 = tpu.matmul %75, %76, %cst_24 {dimension_numbers = #tpu.dot_dimension_numbers<[1], [0], [0], [1], [0, 0, 1, 1], [], []>} : vector<4x4xbf16>, vector<4x256xbf16>, vector<4x256xf32> -> vector<4x256xf32>
    %78 = arith.index_cast %arg1 : i32 to index
    %c0_25 = arith.constant 0 : index
    %c0_26 = arith.constant 0 : index
    %79 = vector.load %arg7[%78, %c0_25, %c0_26] : memref<2x4x1xf32, #tpu.memory_space<vmem>>, vector<1x4x1xf32>
    %80 = vector.shape_cast %79 : vector<1x4x1xf32> to vector<4x1xf32>
    %81 = vector.broadcast %80 : vector<4x1xf32> to vector<4x256xf32>
    %82 = arith.addf %77, %81 : vector<4x256xf32>
    %83 = arith.index_cast %arg1 : i32 to index
    %c0_27 = arith.constant 0 : index
    %c0_28 = arith.constant 0 : index
    %84 = vector.load %arg8[%83, %c0_27, %c0_28] : memref<2x4x256xf32, #tpu.memory_space<vmem>>, vector<1x4x256xf32>
    %85 = vector.shape_cast %84 : vector<1x4x256xf32> to vector<4x256xf32>
    %86 = arith.index_cast %arg1 : i32 to index
    %c0_29 = arith.constant 0 : index
    %c0_30 = arith.constant 0 : index
    %87 = vector.load %arg9[%86, %c0_29, %c0_30] : memref<2x4x256xf32, #tpu.memory_space<vmem>>, vector<1x4x256xf32>
    %88 = vector.shape_cast %87 : vector<1x4x256xf32> to vector<4x256xf32>
    %89 = vector.shape_cast %82 : vector<4x256xf32> to vector<1x4x256xf32>
    %cst_31 = arith.constant dense<0.000000e+00> : vector<1xf32>
    %90 = vector.multi_reduction <add>, %89, %cst_31 [1, 2] : vector<1x4x256xf32> to vector<1xf32>
    %91 = vector.shape_cast %90 : vector<1xf32> to vector<1x1x1xf32>
    %92 = vector.extract %91[0, 0, 0] : f32 from vector<1x1x1xf32>
    %cst_32 = arith.constant 9.765625E-4 : f32
    %93 = arith.mulf %92, %cst_32 : f32
    %94 = vector.broadcast %93 : f32 to vector<4x256xf32>
    %95 = arith.subf %82, %94 : vector<4x256xf32>
    %96 = arith.mulf %95, %95 : vector<4x256xf32>
    %97 = vector.shape_cast %96 : vector<4x256xf32> to vector<1x4x256xf32>
    %cst_33 = arith.constant dense<0.000000e+00> : vector<1xf32>
    %98 = vector.multi_reduction <add>, %97, %cst_33 [1, 2] : vector<1x4x256xf32> to vector<1xf32>
    %99 = vector.shape_cast %98 : vector<1xf32> to vector<1x1x1xf32>
    %100 = vector.extract %99[0, 0, 0] : f32 from vector<1x1x1xf32>
    %cst_34 = arith.constant 9.765625E-4 : f32
    %101 = arith.mulf %100, %cst_34 : f32
    %cst_35 = arith.constant 9.99999974E-6 : f32
    %102 = arith.addf %101, %cst_35 : f32
    %103 = math.rsqrt %102 : f32
    %104 = vector.broadcast %103 : f32 to vector<4x256xf32>
    %105 = arith.mulf %95, %104 : vector<4x256xf32>
    %106 = arith.mulf %105, %85 : vector<4x256xf32>
    %107 = arith.addf %106, %88 : vector<4x256xf32>
    %108 = arith.addf %3, %107 : vector<4x256xf32>
    %109 = arith.index_cast %arg1 : i32 to index
    %c0_36 = arith.constant 0 : index
    %c0_37 = arith.constant 0 : index
    %110 = vector.load %arg10[%109, %c0_36, %c0_37] : memref<2x4x4xbf16, #tpu.memory_space<vmem>>, vector<1x4x4xbf16>
    %111 = vector.shape_cast %110 : vector<1x4x4xbf16> to vector<4x4xbf16>
    %112 = arith.truncf %108 : vector<4x256xf32> to vector<4x256xbf16>
    %cst_38 = arith.constant dense<0.000000e+00> : vector<4x256xf32>
    %113 = tpu.matmul %111, %112, %cst_38 {dimension_numbers = #tpu.dot_dimension_numbers<[1], [0], [0], [1], [0, 0, 1, 1], [], []>} : vector<4x4xbf16>, vector<4x256xbf16>, vector<4x256xf32> -> vector<4x256xf32>
    %114 = arith.index_cast %arg1 : i32 to index
    %c0_39 = arith.constant 0 : index
    %c0_40 = arith.constant 0 : index
    %115 = vector.load %arg11[%114, %c0_39, %c0_40] : memref<2x4x1xf32, #tpu.memory_space<vmem>>, vector<1x4x1xf32>
    %116 = vector.shape_cast %115 : vector<1x4x1xf32> to vector<4x1xf32>
    %117 = vector.broadcast %116 : vector<4x1xf32> to vector<4x256xf32>
    %118 = arith.addf %113, %117 : vector<4x256xf32>
    %cst_41 = arith.constant 5.000000e-01 : f32
    %119 = vector.broadcast %cst_41 : f32 to vector<4x256xf32>
    %120 = arith.mulf %119, %118 : vector<4x256xf32>
    %cst_42 = arith.constant 4.471500e-02 : f32
    %121 = vector.broadcast %cst_42 : f32 to vector<4x256xf32>
    %122 = arith.mulf %121, %118 : vector<4x256xf32>
    %123 = arith.mulf %122, %118 : vector<4x256xf32>
    %124 = arith.mulf %123, %118 : vector<4x256xf32>
    %125 = arith.addf %118, %124 : vector<4x256xf32>
    %cst_43 = arith.constant 0.797884583 : f32
    %126 = vector.broadcast %cst_43 : f32 to vector<4x256xf32>
    %127 = arith.mulf %126, %125 : vector<4x256xf32>
    %128 = math.tanh %127 : vector<4x256xf32>
    %cst_44 = arith.constant 1.000000e+00 : f32
    %129 = vector.broadcast %cst_44 : f32 to vector<4x256xf32>
    %130 = arith.addf %129, %128 : vector<4x256xf32>
    %131 = arith.mulf %120, %130 : vector<4x256xf32>
    %132 = arith.index_cast %arg1 : i32 to index
    %c0_45 = arith.constant 0 : index
    %c0_46 = arith.constant 0 : index
    %133 = vector.load %arg12[%132, %c0_45, %c0_46] : memref<2x4x4xbf16, #tpu.memory_space<vmem>>, vector<1x4x4xbf16>
    %134 = vector.shape_cast %133 : vector<1x4x4xbf16> to vector<4x4xbf16>
    %135 = arith.truncf %131 : vector<4x256xf32> to vector<4x256xbf16>
    %cst_47 = arith.constant dense<0.000000e+00> : vector<4x256xf32>
    %136 = tpu.matmul %134, %135, %cst_47 {dimension_numbers = #tpu.dot_dimension_numbers<[1], [0], [0], [1], [0, 0, 1, 1], [], []>} : vector<4x4xbf16>, vector<4x256xbf16>, vector<4x256xf32> -> vector<4x256xf32>
    %137 = arith.index_cast %arg1 : i32 to index
    %c0_48 = arith.constant 0 : index
    %c0_49 = arith.constant 0 : index
    %138 = vector.load %arg13[%137, %c0_48, %c0_49] : memref<2x4x1xf32, #tpu.memory_space<vmem>>, vector<1x4x1xf32>
    %139 = vector.shape_cast %138 : vector<1x4x1xf32> to vector<4x1xf32>
    %140 = vector.broadcast %139 : vector<4x1xf32> to vector<4x256xf32>
    %141 = arith.addf %136, %140 : vector<4x256xf32>
    %142 = arith.index_cast %arg1 : i32 to index
    %c0_50 = arith.constant 0 : index
    %c0_51 = arith.constant 0 : index
    %143 = vector.load %arg14[%142, %c0_50, %c0_51] : memref<2x4x256xf32, #tpu.memory_space<vmem>>, vector<1x4x256xf32>
    %144 = vector.shape_cast %143 : vector<1x4x256xf32> to vector<4x256xf32>
    %145 = arith.index_cast %arg1 : i32 to index
    %c0_52 = arith.constant 0 : index
    %c0_53 = arith.constant 0 : index
    %146 = vector.load %arg15[%145, %c0_52, %c0_53] : memref<2x4x256xf32, #tpu.memory_space<vmem>>, vector<1x4x256xf32>
    %147 = vector.shape_cast %146 : vector<1x4x256xf32> to vector<4x256xf32>
    %148 = vector.shape_cast %141 : vector<4x256xf32> to vector<1x4x256xf32>
    %cst_54 = arith.constant dense<0.000000e+00> : vector<1xf32>
    %149 = vector.multi_reduction <add>, %148, %cst_54 [1, 2] : vector<1x4x256xf32> to vector<1xf32>
    %150 = vector.shape_cast %149 : vector<1xf32> to vector<1x1x1xf32>
    %151 = vector.extract %150[0, 0, 0] : f32 from vector<1x1x1xf32>
    %cst_55 = arith.constant 9.765625E-4 : f32
    %152 = arith.mulf %151, %cst_55 : f32
    %153 = vector.broadcast %152 : f32 to vector<4x256xf32>
    %154 = arith.subf %141, %153 : vector<4x256xf32>
    %155 = arith.mulf %154, %154 : vector<4x256xf32>
    %156 = vector.shape_cast %155 : vector<4x256xf32> to vector<1x4x256xf32>
    %cst_56 = arith.constant dense<0.000000e+00> : vector<1xf32>
    %157 = vector.multi_reduction <add>, %156, %cst_56 [1, 2] : vector<1x4x256xf32> to vector<1xf32>
    %158 = vector.shape_cast %157 : vector<1xf32> to vector<1x1x1xf32>
    %159 = vector.extract %158[0, 0, 0] : f32 from vector<1x1x1xf32>
    %cst_57 = arith.constant 9.765625E-4 : f32
    %160 = arith.mulf %159, %cst_57 : f32
    %cst_58 = arith.constant 9.99999974E-6 : f32
    %161 = arith.addf %160, %cst_58 : f32
    %162 = math.rsqrt %161 : f32
    %163 = vector.broadcast %162 : f32 to vector<4x256xf32>
    %164 = arith.mulf %154, %163 : vector<4x256xf32>
    %165 = arith.mulf %164, %144 : vector<4x256xf32>
    %166 = arith.addf %165, %147 : vector<4x256xf32>
    %167 = arith.addf %4, %166 : vector<4x256xf32>
    %c0_59 = arith.constant 0 : index
    %c0_60 = arith.constant 0 : index
    %168 = vector.load %arg17[%c0_59, %c0_60] : memref<4x256xf32, #tpu.memory_space<vmem>>, vector<4x256xf32>
    tpu.vector_store %arg17[%c0_59, %c0_60], %108 {strides = array<i32>} : memref<4x256xf32, #tpu.memory_space<vmem>>, vector<4x256xf32>,
    %c0_61 = arith.constant 0 : index
    %c0_62 = arith.constant 0 : index
    %169 = vector.load %arg18[%c0_61, %c0_62] : memref<4x256xf32, #tpu.memory_space<vmem>>, vector<4x256xf32>
    tpu.vector_store %arg18[%c0_61, %c0_62], %167 {strides = array<i32>} : memref<4x256xf32, #tpu.memory_space<vmem>>, vector<4x256xf32>,
    %c1_i32_63 = arith.constant 1 : i32
    %170 = arith.cmpi eq, %arg1, %c1_i32_63 : i32
    %171 = arith.extui %170 : i1 to i32
    %c0_i32_64 = arith.constant 0 : i32
    %172 = arith.cmpi ne, %171, %c0_i32_64 : i32
    scf.if %172 {
      %173 = arith.addf %108, %167 : vector<4x256xf32>
      %cst_65 = arith.constant 5.000000e-01 : f32
      %174 = vector.broadcast %cst_65 : f32 to vector<4x256xf32>
      %175 = arith.mulf %173, %174 : vector<4x256xf32>
      %c0_66 = arith.constant 0 : index
      %c0_67 = arith.constant 0 : index
      %c0_68 = arith.constant 0 : index
      %176 = vector.load %arg16[%c0_66, %c0_67, %c0_68] : memref<1x4x256xf32, #tpu.memory_space<vmem>>, vector<1x4x256xf32>
      %177 = vector.shape_cast %176 : vector<1x4x256xf32> to vector<4x256xf32>
      %178 = vector.shape_cast %175 : vector<4x256xf32> to vector<1x4x256xf32>
      tpu.vector_store %arg16[%c0_66, %c0_67, %c0_68], %178 {strides = array<i32>} : memref<1x4x256xf32, #tpu.memory_space<vmem>>, vector<1x4x256xf32>,
    } else {
    }
    return
  }
  func.func @transform_0(%arg0: i32, %arg1: i32) -> (i32, i32, i32) {
    %c0_i32 = arith.constant 0 : i32
    %c0_i32_0 = arith.constant 0 : i32
    %c0_i32_1 = arith.constant 0 : i32
    return %arg0, %c0_i32, %c0_i32_0 : i32, i32, i32
  }
  func.func @transform_1(%arg0: i32, %arg1: i32) -> (i32, i32) {
    %c0_i32 = arith.constant 0 : i32
    %c0_i32_0 = arith.constant 0 : i32
    %c0_i32_1 = arith.constant 0 : i32
    return %c0_i32, %c0_i32_0 : i32, i32
  }
  func.func @transform_2(%arg0: i32, %arg1: i32) -> (i32, i32, i32) {
    %c0_i32 = arith.constant 0 : i32
    %c0_i32_0 = arith.constant 0 : i32
    %c0_i32_1 = arith.constant 0 : i32
    %c0_i32_2 = arith.constant 0 : i32
    return %c0_i32, %c0_i32_0, %c0_i32_1 : i32, i32, i32
  }
  func.func @transform_3(%arg0: i32, %arg1: i32) -> (i32, i32, i32) {
    %c0_i32 = arith.constant 0 : i32
    %c0_i32_0 = arith.constant 0 : i32
    %c0_i32_1 = arith.constant 0 : i32
    %c0_i32_2 = arith.constant 0 : i32
    return %c0_i32, %c0_i32_0, %c0_i32_1 : i32, i32, i32
  }
  func.func @transform_4(%arg0: i32, %arg1: i32) -> (i32, i32, i32) {
    %c0_i32 = arith.constant 0 : i32
    %c0_i32_0 = arith.constant 0 : i32
    %c0_i32_1 = arith.constant 0 : i32
    %c0_i32_2 = arith.constant 0 : i32
    return %c0_i32, %c0_i32_0, %c0_i32_1 : i32, i32, i32
  }
  func.func @transform_5(%arg0: i32, %arg1: i32) -> (i32, i32, i32) {
    %c0_i32 = arith.constant 0 : i32
    %c0_i32_0 = arith.constant 0 : i32
    %c0_i32_1 = arith.constant 0 : i32
    %c0_i32_2 = arith.constant 0 : i32
    return %c0_i32, %c0_i32_0, %c0_i32_1 : i32, i32, i32
  }
  func.func @transform_6(%arg0: i32, %arg1: i32) -> (i32, i32, i32) {
    %c0_i32 = arith.constant 0 : i32
    %c0_i32_0 = arith.constant 0 : i32
    %c0_i32_1 = arith.constant 0 : i32
    %c0_i32_2 = arith.constant 0 : i32
    return %c0_i32, %c0_i32_0, %c0_i32_1 : i32, i32, i32
  }
  func.func @transform_7(%arg0: i32, %arg1: i32) -> (i32, i32, i32) {
    %c0_i32 = arith.constant 0 : i32
    %c0_i32_0 = arith.constant 0 : i32
    %c0_i32_1 = arith.constant 0 : i32
    %c0_i32_2 = arith.constant 0 : i32
    return %c0_i32, %c0_i32_0, %c0_i32_1 : i32, i32, i32
  }
  func.func @transform_8(%arg0: i32, %arg1: i32) -> (i32, i32, i32) {
    %c0_i32 = arith.constant 0 : i32
    %c0_i32_0 = arith.constant 0 : i32
    %c0_i32_1 = arith.constant 0 : i32
    %c0_i32_2 = arith.constant 0 : i32
    return %c0_i32, %c0_i32_0, %c0_i32_1 : i32, i32, i32
  }
  func.func @transform_9(%arg0: i32, %arg1: i32) -> (i32, i32, i32) {
    %c0_i32 = arith.constant 0 : i32
    %c0_i32_0 = arith.constant 0 : i32
    %c0_i32_1 = arith.constant 0 : i32
    %c0_i32_2 = arith.constant 0 : i32
    return %c0_i32, %c0_i32_0, %c0_i32_1 : i32, i32, i32
  }
  func.func @transform_10(%arg0: i32, %arg1: i32) -> (i32, i32, i32) {
    %c0_i32 = arith.constant 0 : i32
    %c0_i32_0 = arith.constant 0 : i32
    %c0_i32_1 = arith.constant 0 : i32
    %c0_i32_2 = arith.constant 0 : i32
    return %c0_i32, %c0_i32_0, %c0_i32_1 : i32, i32, i32
  }
  func.func @transform_11(%arg0: i32, %arg1: i32) -> (i32, i32, i32) {
    %c0_i32 = arith.constant 0 : i32
    %c0_i32_0 = arith.constant 0 : i32
    %c0_i32_1 = arith.constant 0 : i32
    %c0_i32_2 = arith.constant 0 : i32
    return %c0_i32, %c0_i32_0, %c0_i32_1 : i32, i32, i32
  }
  func.func @transform_12(%arg0: i32, %arg1: i32) -> (i32, i32, i32) {
    %c0_i32 = arith.constant 0 : i32
    %c0_i32_0 = arith.constant 0 : i32
    %c0_i32_1 = arith.constant 0 : i32
    %c0_i32_2 = arith.constant 0 : i32
    return %c0_i32, %c0_i32_0, %c0_i32_1 : i32, i32, i32
  }
  func.func @transform_13(%arg0: i32, %arg1: i32) -> (i32, i32, i32) {
    %c0_i32 = arith.constant 0 : i32
    %c0_i32_0 = arith.constant 0 : i32
    %c0_i32_1 = arith.constant 0 : i32
    %c0_i32_2 = arith.constant 0 : i32
    return %c0_i32, %c0_i32_0, %c0_i32_1 : i32, i32, i32
  }
  func.func @transform_14(%arg0: i32, %arg1: i32) -> (i32, i32, i32) {
    %c0_i32 = arith.constant 0 : i32
    %c0_i32_0 = arith.constant 0 : i32
    %c0_i32_1 = arith.constant 0 : i32
    return %arg0, %c0_i32, %c0_i32_0 : i32, i32, i32
  }
}

module attributes {stable_mosaic.version = 11 : i64} {
  func.func @_transition_conv_kernel(%arg0: i32, %arg1: memref<1x4x64xbf16, #tpu.memory_space<vmem>>, %arg2: memref<8x4xbf16, #tpu.memory_space<vmem>>, %arg3: memref<8x1xf32, #tpu.memory_space<vmem>>, %arg4: memref<1x8x64xf32, #tpu.memory_space<vmem>>) attributes {dimension_semantics = [#tpu.dimension_semantics<parallel>], iteration_bounds = array<i64: 2>, scalar_prefetch = 0 : i64, scratch_operands = 0 : i64, tpu.core_type = #tpu.core_type<tc>, window_params = [{transform_indices = @transform_0, window_bounds = array<i64: 1, 4, 64>}, {pipeline_mode = #tpu.pipeline_mode<synchronous>, transform_indices = @transform_1, window_bounds = array<i64: 8, 4>}, {pipeline_mode = #tpu.pipeline_mode<synchronous>, transform_indices = @transform_2, window_bounds = array<i64: 8, 1>}, {transform_indices = @transform_3, window_bounds = array<i64: 1, 8, 64>}]} {
    %c0 = arith.constant 0 : index
    %c0_0 = arith.constant 0 : index
    %0 = vector.load %arg2[%c0, %c0_0] : memref<8x4xbf16, #tpu.memory_space<vmem>>, vector<8x4xbf16>
    %c0_1 = arith.constant 0 : index
    %c0_2 = arith.constant 0 : index
    %c0_3 = arith.constant 0 : index
    %1 = vector.load %arg1[%c0_1, %c0_2, %c0_3] : memref<1x4x64xbf16, #tpu.memory_space<vmem>>, vector<1x4x64xbf16>
    %2 = vector.shape_cast %1 : vector<1x4x64xbf16> to vector<4x64xbf16>
    %cst = arith.constant dense<0.000000e+00> : vector<8x64xf32>
    %3 = tpu.matmul %0, %2, %cst {dimension_numbers = #tpu.dot_dimension_numbers<[1], [0], [0], [1], [0, 0, 1, 1], [], []>} : vector<8x4xbf16>, vector<4x64xbf16>, vector<8x64xf32> -> vector<8x64xf32>
    %c0_4 = arith.constant 0 : index
    %c0_5 = arith.constant 0 : index
    %4 = vector.load %arg3[%c0_4, %c0_5] : memref<8x1xf32, #tpu.memory_space<vmem>>, vector<8x1xf32>
    %5 = vector.broadcast %4 : vector<8x1xf32> to vector<8x64xf32>
    %6 = arith.addf %3, %5 : vector<8x64xf32>
    %c0_6 = arith.constant 0 : index
    %c0_7 = arith.constant 0 : index
    %c0_8 = arith.constant 0 : index
    %7 = vector.load %arg4[%c0_6, %c0_7, %c0_8] : memref<1x8x64xf32, #tpu.memory_space<vmem>>, vector<1x8x64xf32>
    %8 = vector.shape_cast %7 : vector<1x8x64xf32> to vector<8x64xf32>
    %9 = vector.shape_cast %6 : vector<8x64xf32> to vector<1x8x64xf32>
    tpu.vector_store %arg4[%c0_6, %c0_7, %c0_8], %9 {strides = array<i32>} : memref<1x8x64xf32, #tpu.memory_space<vmem>>, vector<1x8x64xf32>,
    return
  }
  func.func @transform_0(%arg0: i32) -> (i32, i32, i32) {
    %c0_i32 = arith.constant 0 : i32
    %c0_i32_0 = arith.constant 0 : i32
    %c0_i32_1 = arith.constant 0 : i32
    return %arg0, %c0_i32, %c0_i32_0 : i32, i32, i32
  }
  func.func @transform_1(%arg0: i32) -> (i32, i32) {
    %c0_i32 = arith.constant 0 : i32
    %c0_i32_0 = arith.constant 0 : i32
    %c0_i32_1 = arith.constant 0 : i32
    return %c0_i32, %c0_i32_0 : i32, i32
  }
  func.func @transform_2(%arg0: i32) -> (i32, i32) {
    %c0_i32 = arith.constant 0 : i32
    %c0_i32_0 = arith.constant 0 : i32
    %c0_i32_1 = arith.constant 0 : i32
    return %c0_i32, %c0_i32_0 : i32, i32
  }
  func.func @transform_3(%arg0: i32) -> (i32, i32, i32) {
    %c0_i32 = arith.constant 0 : i32
    %c0_i32_0 = arith.constant 0 : i32
    %c0_i32_1 = arith.constant 0 : i32
    return %arg0, %c0_i32, %c0_i32_0 : i32, i32, i32
  }
}

module attributes {stable_mosaic.version = 11 : i64} {
  func.func @_stage_kernel(%arg0: i32, %arg1: i32, %arg2: memref<1x8x64xf32, #tpu.memory_space<vmem>>, %arg3: memref<2x64xi32, #tpu.memory_space<vmem>>, %arg4: memref<1x8x8xbf16, #tpu.memory_space<vmem>>, %arg5: memref<1x8x1xf32, #tpu.memory_space<vmem>>, %arg6: memref<1x8x8xbf16, #tpu.memory_space<vmem>>, %arg7: memref<1x8x1xf32, #tpu.memory_space<vmem>>, %arg8: memref<1x8x64xf32, #tpu.memory_space<vmem>>, %arg9: memref<1x8x64xf32, #tpu.memory_space<vmem>>, %arg10: memref<1x8x8xbf16, #tpu.memory_space<vmem>>, %arg11: memref<1x8x1xf32, #tpu.memory_space<vmem>>, %arg12: memref<1x8x8xbf16, #tpu.memory_space<vmem>>, %arg13: memref<1x8x1xf32, #tpu.memory_space<vmem>>, %arg14: memref<1x8x64xf32, #tpu.memory_space<vmem>>, %arg15: memref<1x8x64xf32, #tpu.memory_space<vmem>>, %arg16: memref<1x8x64xf32, #tpu.memory_space<vmem>>, %arg17: memref<8x64xf32, #tpu.memory_space<vmem>>, %arg18: memref<8x64xf32, #tpu.memory_space<vmem>>, %arg19: memref<8x64xf32, #tpu.memory_space<vmem>>) attributes {dimension_semantics = [#tpu.dimension_semantics<parallel>, #tpu.dimension_semantics<arbitrary>], iteration_bounds = array<i64: 2, 1>, scalar_prefetch = 0 : i64, scratch_operands = 3 : i64, tpu.core_type = #tpu.core_type<tc>, window_params = [{transform_indices = @transform_0, window_bounds = array<i64: 1, 8, 64>}, {pipeline_mode = #tpu.pipeline_mode<synchronous>, transform_indices = @transform_1, window_bounds = array<i64: 2, 64>}, {pipeline_mode = #tpu.pipeline_mode<synchronous>, transform_indices = @transform_2, window_bounds = array<i64: 1, 8, 8>}, {pipeline_mode = #tpu.pipeline_mode<synchronous>, transform_indices = @transform_3, window_bounds = array<i64: 1, 8, 1>}, {pipeline_mode = #tpu.pipeline_mode<synchronous>, transform_indices = @transform_4, window_bounds = array<i64: 1, 8, 8>}, {pipeline_mode = #tpu.pipeline_mode<synchronous>, transform_indices = @transform_5, window_bounds = array<i64: 1, 8, 1>}, {pipeline_mode = #tpu.pipeline_mode<synchronous>, transform_indices = @transform_6, window_bounds = array<i64: 1, 8, 64>}, {pipeline_mode = #tpu.pipeline_mode<synchronous>, transform_indices = @transform_7, window_bounds = array<i64: 1, 8, 64>}, {pipeline_mode = #tpu.pipeline_mode<synchronous>, transform_indices = @transform_8, window_bounds = array<i64: 1, 8, 8>}, {pipeline_mode = #tpu.pipeline_mode<synchronous>, transform_indices = @transform_9, window_bounds = array<i64: 1, 8, 1>}, {pipeline_mode = #tpu.pipeline_mode<synchronous>, transform_indices = @transform_10, window_bounds = array<i64: 1, 8, 8>}, {pipeline_mode = #tpu.pipeline_mode<synchronous>, transform_indices = @transform_11, window_bounds = array<i64: 1, 8, 1>}, {pipeline_mode = #tpu.pipeline_mode<synchronous>, transform_indices = @transform_12, window_bounds = array<i64: 1, 8, 64>}, {pipeline_mode = #tpu.pipeline_mode<synchronous>, transform_indices = @transform_13, window_bounds = array<i64: 1, 8, 64>}, {transform_indices = @transform_14, window_bounds = array<i64: 1, 8, 64>}]} {
    %c0_i32 = arith.constant 0 : i32
    %0 = arith.cmpi eq, %arg1, %c0_i32 : i32
    %1 = arith.extui %0 : i1 to i32
    %c0_i32_0 = arith.constant 0 : i32
    %2 = arith.cmpi ne, %1, %c0_i32_0 : i32
    scf.if %2 {
      %c0_64 = arith.constant 0 : index
      %c0_65 = arith.constant 0 : index
      %c0_66 = arith.constant 0 : index
      %173 = vector.load %arg2[%c0_64, %c0_65, %c0_66] : memref<1x8x64xf32, #tpu.memory_space<vmem>>, vector<1x1x64xf32>
      %174 = vector.shape_cast %173 : vector<1x1x64xf32> to vector<1x64xf32>
      %c0_67 = arith.constant 0 : index
      %c0_68 = arith.constant 0 : index
      %175 = vector.load %arg17[%c0_67, %c0_68] : memref<8x64xf32, #tpu.memory_space<vmem>>, vector<1x64xf32>
      tpu.vector_store %arg17[%c0_67, %c0_68], %174 {strides = array<i32>} : memref<8x64xf32, #tpu.memory_space<vmem>>, vector<1x64xf32>,
      %c1 = arith.constant 1 : index
      %c0_69 = arith.constant 0 : index
      %176 = vector.load %arg17[%c1, %c0_69] : memref<8x64xf32, #tpu.memory_space<vmem>>, vector<1x64xf32>
      tpu.vector_store %arg17[%c1, %c0_69], %174 {strides = array<i32>} : memref<8x64xf32, #tpu.memory_space<vmem>>, vector<1x64xf32>,
      %c0_70 = arith.constant 0 : index
      %c4 = arith.constant 4 : index
      %c0_71 = arith.constant 0 : index
      %177 = vector.load %arg2[%c0_70, %c4, %c0_71] : memref<1x8x64xf32, #tpu.memory_space<vmem>>, vector<1x1x64xf32>
      %178 = vector.shape_cast %177 : vector<1x1x64xf32> to vector<1x64xf32>
      %c0_72 = arith.constant 0 : index
      %c0_73 = arith.constant 0 : index
      %179 = vector.load %arg18[%c0_72, %c0_73] : memref<8x64xf32, #tpu.memory_space<vmem>>, vector<1x64xf32>
      tpu.vector_store %arg18[%c0_72, %c0_73], %178 {strides = array<i32>} : memref<8x64xf32, #tpu.memory_space<vmem>>, vector<1x64xf32>,
      %c1_74 = arith.constant 1 : index
      %c0_75 = arith.constant 0 : index
      %180 = vector.load %arg18[%c1_74, %c0_75] : memref<8x64xf32, #tpu.memory_space<vmem>>, vector<1x64xf32>
      tpu.vector_store %arg18[%c1_74, %c0_75], %178 {strides = array<i32>} : memref<8x64xf32, #tpu.memory_space<vmem>>, vector<1x64xf32>,
      %c0_76 = arith.constant 0 : index
      %c1_77 = arith.constant 1 : index
      %c0_78 = arith.constant 0 : index
      %181 = vector.load %arg2[%c0_76, %c1_77, %c0_78] : memref<1x8x64xf32, #tpu.memory_space<vmem>>, vector<1x1x64xf32>
      %182 = vector.shape_cast %181 : vector<1x1x64xf32> to vector<1x64xf32>
      %c2 = arith.constant 2 : index
      %c0_79 = arith.constant 0 : index
      %183 = vector.load %arg17[%c2, %c0_79] : memref<8x64xf32, #tpu.memory_space<vmem>>, vector<1x64xf32>
      tpu.vector_store %arg17[%c2, %c0_79], %182 {strides = array<i32>} : memref<8x64xf32, #tpu.memory_space<vmem>>, vector<1x64xf32>,
      %c3 = arith.constant 3 : index
      %c0_80 = arith.constant 0 : index
      %184 = vector.load %arg17[%c3, %c0_80] : memref<8x64xf32, #tpu.memory_space<vmem>>, vector<1x64xf32>
      tpu.vector_store %arg17[%c3, %c0_80], %182 {strides = array<i32>} : memref<8x64xf32, #tpu.memory_space<vmem>>, vector<1x64xf32>,
      %c0_81 = arith.constant 0 : index
      %c5 = arith.constant 5 : index
      %c0_82 = arith.constant 0 : index
      %185 = vector.load %arg2[%c0_81, %c5, %c0_82] : memref<1x8x64xf32, #tpu.memory_space<vmem>>, vector<1x1x64xf32>
      %186 = vector.shape_cast %185 : vector<1x1x64xf32> to vector<1x64xf32>
      %c2_83 = arith.constant 2 : index
      %c0_84 = arith.constant 0 : index
      %187 = vector.load %arg18[%c2_83, %c0_84] : memref<8x64xf32, #tpu.memory_space<vmem>>, vector<1x64xf32>
      tpu.vector_store %arg18[%c2_83, %c0_84], %186 {strides = array<i32>} : memref<8x64xf32, #tpu.memory_space<vmem>>, vector<1x64xf32>,
      %c3_85 = arith.constant 3 : index
      %c0_86 = arith.constant 0 : index
      %188 = vector.load %arg18[%c3_85, %c0_86] : memref<8x64xf32, #tpu.memory_space<vmem>>, vector<1x64xf32>
      tpu.vector_store %arg18[%c3_85, %c0_86], %186 {strides = array<i32>} : memref<8x64xf32, #tpu.memory_space<vmem>>, vector<1x64xf32>,
      %c0_87 = arith.constant 0 : index
      %c2_88 = arith.constant 2 : index
      %c0_89 = arith.constant 0 : index
      %189 = vector.load %arg2[%c0_87, %c2_88, %c0_89] : memref<1x8x64xf32, #tpu.memory_space<vmem>>, vector<1x1x64xf32>
      %190 = vector.shape_cast %189 : vector<1x1x64xf32> to vector<1x64xf32>
      %c4_90 = arith.constant 4 : index
      %c0_91 = arith.constant 0 : index
      %191 = vector.load %arg17[%c4_90, %c0_91] : memref<8x64xf32, #tpu.memory_space<vmem>>, vector<1x64xf32>
      tpu.vector_store %arg17[%c4_90, %c0_91], %190 {strides = array<i32>} : memref<8x64xf32, #tpu.memory_space<vmem>>, vector<1x64xf32>,
      %c5_92 = arith.constant 5 : index
      %c0_93 = arith.constant 0 : index
      %192 = vector.load %arg17[%c5_92, %c0_93] : memref<8x64xf32, #tpu.memory_space<vmem>>, vector<1x64xf32>
      tpu.vector_store %arg17[%c5_92, %c0_93], %190 {strides = array<i32>} : memref<8x64xf32, #tpu.memory_space<vmem>>, vector<1x64xf32>,
      %c0_94 = arith.constant 0 : index
      %c6 = arith.constant 6 : index
      %c0_95 = arith.constant 0 : index
      %193 = vector.load %arg2[%c0_94, %c6, %c0_95] : memref<1x8x64xf32, #tpu.memory_space<vmem>>, vector<1x1x64xf32>
      %194 = vector.shape_cast %193 : vector<1x1x64xf32> to vector<1x64xf32>
      %c4_96 = arith.constant 4 : index
      %c0_97 = arith.constant 0 : index
      %195 = vector.load %arg18[%c4_96, %c0_97] : memref<8x64xf32, #tpu.memory_space<vmem>>, vector<1x64xf32>
      tpu.vector_store %arg18[%c4_96, %c0_97], %194 {strides = array<i32>} : memref<8x64xf32, #tpu.memory_space<vmem>>, vector<1x64xf32>,
      %c5_98 = arith.constant 5 : index
      %c0_99 = arith.constant 0 : index
      %196 = vector.load %arg18[%c5_98, %c0_99] : memref<8x64xf32, #tpu.memory_space<vmem>>, vector<1x64xf32>
      tpu.vector_store %arg18[%c5_98, %c0_99], %194 {strides = array<i32>} : memref<8x64xf32, #tpu.memory_space<vmem>>, vector<1x64xf32>,
      %c0_100 = arith.constant 0 : index
      %c3_101 = arith.constant 3 : index
      %c0_102 = arith.constant 0 : index
      %197 = vector.load %arg2[%c0_100, %c3_101, %c0_102] : memref<1x8x64xf32, #tpu.memory_space<vmem>>, vector<1x1x64xf32>
      %198 = vector.shape_cast %197 : vector<1x1x64xf32> to vector<1x64xf32>
      %c6_103 = arith.constant 6 : index
      %c0_104 = arith.constant 0 : index
      %199 = vector.load %arg17[%c6_103, %c0_104] : memref<8x64xf32, #tpu.memory_space<vmem>>, vector<1x64xf32>
      tpu.vector_store %arg17[%c6_103, %c0_104], %198 {strides = array<i32>} : memref<8x64xf32, #tpu.memory_space<vmem>>, vector<1x64xf32>,
      %c7 = arith.constant 7 : index
      %c0_105 = arith.constant 0 : index
      %200 = vector.load %arg17[%c7, %c0_105] : memref<8x64xf32, #tpu.memory_space<vmem>>, vector<1x64xf32>
      tpu.vector_store %arg17[%c7, %c0_105], %198 {strides = array<i32>} : memref<8x64xf32, #tpu.memory_space<vmem>>, vector<1x64xf32>,
      %c0_106 = arith.constant 0 : index
      %c7_107 = arith.constant 7 : index
      %c0_108 = arith.constant 0 : index
      %201 = vector.load %arg2[%c0_106, %c7_107, %c0_108] : memref<1x8x64xf32, #tpu.memory_space<vmem>>, vector<1x1x64xf32>
      %202 = vector.shape_cast %201 : vector<1x1x64xf32> to vector<1x64xf32>
      %c6_109 = arith.constant 6 : index
      %c0_110 = arith.constant 0 : index
      %203 = vector.load %arg18[%c6_109, %c0_110] : memref<8x64xf32, #tpu.memory_space<vmem>>, vector<1x64xf32>
      tpu.vector_store %arg18[%c6_109, %c0_110], %202 {strides = array<i32>} : memref<8x64xf32, #tpu.memory_space<vmem>>, vector<1x64xf32>,
      %c7_111 = arith.constant 7 : index
      %c0_112 = arith.constant 0 : index
      %204 = vector.load %arg18[%c7_111, %c0_112] : memref<8x64xf32, #tpu.memory_space<vmem>>, vector<1x64xf32>
      tpu.vector_store %arg18[%c7_111, %c0_112], %202 {strides = array<i32>} : memref<8x64xf32, #tpu.memory_space<vmem>>, vector<1x64xf32>,
    } else {
    }
    %c0 = arith.constant 0 : index
    %c0_1 = arith.constant 0 : index
    %3 = vector.load %arg17[%c0, %c0_1] : memref<8x64xf32, #tpu.memory_space<vmem>>, vector<8x64xf32>
    %c0_2 = arith.constant 0 : index
    %c0_3 = arith.constant 0 : index
    %4 = vector.load %arg18[%c0_2, %c0_3] : memref<8x64xf32, #tpu.memory_space<vmem>>, vector<8x64xf32>
    %c0_4 = arith.constant 0 : index
    %c0_5 = arith.constant 0 : index
    %5 = vector.load %arg3[%c0_4, %c0_5] : memref<2x64xi32, #tpu.memory_space<vmem>>, vector<2x64xi32>
    %6 = vector.extract_strided_slice %5 {offsets = [0, 0], sizes = [1, 64], strides = [1, 1]} : vector<2x64xi32> to vector<1x64xi32>
    %7 = vector.extract_strided_slice %5 {offsets = [1, 0], sizes = [1, 64], strides = [1, 1]} : vector<2x64xi32> to vector<1x64xi32>
    %c0_i32_6 = arith.constant 0 : i32
    %8 = vector.broadcast %c0_i32_6 : i32 to vector<1x64xi32>
    %9 = arith.cmpi eq, %7, %8 : vector<1x64xi32>
    %c7_i32 = arith.constant 7 : i32
    %10 = vector.broadcast %c7_i32 : i32 to vector<1x64xi32>
    %11 = arith.cmpi eq, %7, %10 : vector<1x64xi32>
    %c0_i32_7 = arith.constant 0 : i32
    %12 = vector.broadcast %c0_i32_7 : i32 to vector<1x64xi32>
    %13 = arith.cmpi eq, %6, %12 : vector<1x64xi32>
    %c7_i32_8 = arith.constant 7 : i32
    %14 = vector.broadcast %c7_i32_8 : i32 to vector<1x64xi32>
    %15 = arith.cmpi eq, %6, %14 : vector<1x64xi32>
    %16 = arith.index_cast %arg1 : i32 to index
    %c0_9 = arith.constant 0 : index
    %c0_10 = arith.constant 0 : index
    %17 = vector.load %arg4[%16, %c0_9, %c0_10] : memref<1x8x8xbf16, #tpu.memory_space<vmem>>, vector<1x8x8xbf16>
    %18 = vector.shape_cast %17 : vector<1x8x8xbf16> to vector<8x8xbf16>
    %19 = arith.truncf %4 : vector<8x64xf32> to vector<8x64xbf16>
    %cst = arith.constant dense<0.000000e+00> : vector<8x64xf32>
    %20 = tpu.matmul %18, %19, %cst {dimension_numbers = #tpu.dot_dimension_numbers<[1], [0], [0], [1], [0, 0, 1, 1], [], []>} : vector<8x8xbf16>, vector<8x64xbf16>, vector<8x64xf32> -> vector<8x64xf32>
    %21 = arith.index_cast %arg1 : i32 to index
    %c0_11 = arith.constant 0 : index
    %c0_12 = arith.constant 0 : index
    %22 = vector.load %arg5[%21, %c0_11, %c0_12] : memref<1x8x1xf32, #tpu.memory_space<vmem>>, vector<1x8x1xf32>
    %23 = vector.shape_cast %22 : vector<1x8x1xf32> to vector<8x1xf32>
    %24 = vector.broadcast %23 : vector<8x1xf32> to vector<8x64xf32>
    %25 = arith.addf %20, %24 : vector<8x64xf32>
    %cst_13 = arith.constant 5.000000e-01 : f32
    %26 = vector.broadcast %cst_13 : f32 to vector<8x64xf32>
    %27 = arith.mulf %26, %25 : vector<8x64xf32>
    %cst_14 = arith.constant 4.471500e-02 : f32
    %28 = vector.broadcast %cst_14 : f32 to vector<8x64xf32>
    %29 = arith.mulf %28, %25 : vector<8x64xf32>
    %30 = arith.mulf %29, %25 : vector<8x64xf32>
    %31 = arith.mulf %30, %25 : vector<8x64xf32>
    %32 = arith.addf %25, %31 : vector<8x64xf32>
    %cst_15 = arith.constant 0.797884583 : f32
    %33 = vector.broadcast %cst_15 : f32 to vector<8x64xf32>
    %34 = arith.mulf %33, %32 : vector<8x64xf32>
    %35 = math.tanh %34 : vector<8x64xf32>
    %cst_16 = arith.constant 1.000000e+00 : f32
    %36 = vector.broadcast %cst_16 : f32 to vector<8x64xf32>
    %37 = arith.addf %36, %35 : vector<8x64xf32>
    %38 = arith.mulf %27, %37 : vector<8x64xf32>
    %39 = tpu.iota {dimensions = array<i32: 0>} : vector<8x1xi32>
    %c2_i32 = arith.constant 2 : i32
    %40 = vector.broadcast %c2_i32 : i32 to vector<8x1xi32>
    %41 = arith.cmpi slt, %39, %40 : vector<8x1xi32>
    %c1_i32 = arith.constant 1 : i32
    %42 = tpu.dynamic_rotate %38 by %c1_i32 dim 1 : vector<8x64xf32>, i32 -> vector<8x64xf32>
    %43 = vector.shape_cast %9 : vector<1x64xi1> to vector<1x64xi1>
    %44 = vector.broadcast %43 : vector<1x64xi1> to vector<8x64xi1>
    %45 = arith.select %44, %38, %42 : vector<8x64xi1>, vector<8x64xf32>
    %c4_i32 = arith.constant 4 : i32
    %46 = vector.broadcast %c4_i32 : i32 to vector<8x1xi32>
    %47 = arith.cmpi slt, %39, %46 : vector<8x1xi32>
    %c63_i32 = arith.constant 63 : i32
    %48 = tpu.dynamic_rotate %38 by %c63_i32 dim 1 : vector<8x64xf32>, i32 -> vector<8x64xf32>
    %49 = vector.shape_cast %11 : vector<1x64xi1> to vector<1x64xi1>
    %50 = vector.broadcast %49 : vector<1x64xi1> to vector<8x64xi1>
    %51 = arith.select %50, %38, %48 : vector<8x64xi1>, vector<8x64xf32>
    %c6_i32 = arith.constant 6 : i32
    %52 = vector.broadcast %c6_i32 : i32 to vector<8x1xi32>
    %53 = arith.cmpi slt, %39, %52 : vector<8x1xi32>
    %c8_i32 = arith.constant 8 : i32
    %54 = tpu.dynamic_rotate %38 by %c8_i32 dim 1 : vector<8x64xf32>, i32 -> vector<8x64xf32>
    %55 = vector.shape_cast %13 : vector<1x64xi1> to vector<1x64xi1>
    %56 = vector.broadcast %55 : vector<1x64xi1> to vector<8x64xi1>
    %57 = arith.select %56, %38, %54 : vector<8x64xi1>, vector<8x64xf32>
    %c56_i32 = arith.constant 56 : i32
    %58 = tpu.dynamic_rotate %38 by %c56_i32 dim 1 : vector<8x64xf32>, i32 -> vector<8x64xf32>
    %59 = vector.shape_cast %15 : vector<1x64xi1> to vector<1x64xi1>
    %60 = vector.broadcast %59 : vector<1x64xi1> to vector<8x64xi1>
    %61 = arith.select %60, %38, %58 : vector<8x64xi1>, vector<8x64xf32>
    %62 = vector.shape_cast %53 : vector<8x1xi1> to vector<8x1xi1>
    %63 = vector.broadcast %62 : vector<8x1xi1> to vector<8x64xi1>
    %64 = arith.select %63, %57, %61 : vector<8x64xi1>, vector<8x64xf32>
    %65 = vector.shape_cast %47 : vector<8x1xi1> to vector<8x1xi1>
    %66 = vector.broadcast %65 : vector<8x1xi1> to vector<8x64xi1>
    %67 = arith.select %66, %51, %64 : vector<8x64xi1>, vector<8x64xf32>
    %68 = vector.shape_cast %41 : vector<8x1xi1> to vector<8x1xi1>
    %69 = vector.broadcast %68 : vector<8x1xi1> to vector<8x64xi1>
    %70 = arith.select %69, %45, %67 : vector<8x64xi1>, vector<8x64xf32>
    %c0_17 = arith.constant 0 : index
    %c0_18 = arith.constant 0 : index
    %71 = vector.load %arg19[%c0_17, %c0_18] : memref<8x64xf32, #tpu.memory_space<vmem>>, vector<8x64xf32>
    tpu.vector_store %arg19[%c0_17, %c0_18], %70 {strides = array<i32>} : memref<8x64xf32, #tpu.memory_space<vmem>>, vector<8x64xf32>,
    %c0_19 = arith.constant 0 : index
    %c0_20 = arith.constant 0 : index
    %72 = vector.load %arg19[%c0_19, %c0_20] : memref<8x64xf32, #tpu.memory_space<vmem>>, vector<8x64xf32>
    %73 = arith.index_cast %arg1 : i32 to index
    %c0_21 = arith.constant 0 : index
    %c0_22 = arith.constant 0 : index
    %74 = vector.load %arg6[%73, %c0_21, %c0_22] : memref<1x8x8xbf16, #tpu.memory_space<vmem>>, vector<1x8x8xbf16>
    %75 = vector.shape_cast %74 : vector<1x8x8xbf16> to vector<8x8xbf16>
    %76 = arith.truncf %72 : vector<8x64xf32> to vector<8x64xbf16>
    %cst_23 = arith.constant dense<0.000000e+00> : vector<8x64xf32>
    %77 = tpu.matmul %75, %76, %cst_23 {dimension_numbers = #tpu.dot_dimension_numbers<[1], [0], [0], [1], [0, 0, 1, 1], [], []>} : vector<8x8xbf16>, vector<8x64xbf16>, vector<8x64xf32> -> vector<8x64xf32>
    %78 = arith.index_cast %arg1 : i32 to index
    %c0_24 = arith.constant 0 : index
    %c0_25 = arith.constant 0 : index
    %79 = vector.load %arg7[%78, %c0_24, %c0_25] : memref<1x8x1xf32, #tpu.memory_space<vmem>>, vector<1x8x1xf32>
    %80 = vector.shape_cast %79 : vector<1x8x1xf32> to vector<8x1xf32>
    %81 = vector.broadcast %80 : vector<8x1xf32> to vector<8x64xf32>
    %82 = arith.addf %77, %81 : vector<8x64xf32>
    %83 = arith.index_cast %arg1 : i32 to index
    %c0_26 = arith.constant 0 : index
    %c0_27 = arith.constant 0 : index
    %84 = vector.load %arg8[%83, %c0_26, %c0_27] : memref<1x8x64xf32, #tpu.memory_space<vmem>>, vector<1x8x64xf32>
    %85 = vector.shape_cast %84 : vector<1x8x64xf32> to vector<8x64xf32>
    %86 = arith.index_cast %arg1 : i32 to index
    %c0_28 = arith.constant 0 : index
    %c0_29 = arith.constant 0 : index
    %87 = vector.load %arg9[%86, %c0_28, %c0_29] : memref<1x8x64xf32, #tpu.memory_space<vmem>>, vector<1x8x64xf32>
    %88 = vector.shape_cast %87 : vector<1x8x64xf32> to vector<8x64xf32>
    %89 = vector.shape_cast %82 : vector<8x64xf32> to vector<1x8x64xf32>
    %cst_30 = arith.constant dense<0.000000e+00> : vector<1xf32>
    %90 = vector.multi_reduction <add>, %89, %cst_30 [1, 2] : vector<1x8x64xf32> to vector<1xf32>
    %91 = vector.shape_cast %90 : vector<1xf32> to vector<1x1x1xf32>
    %92 = vector.extract %91[0, 0, 0] : f32 from vector<1x1x1xf32>
    %cst_31 = arith.constant 0.001953125 : f32
    %93 = arith.mulf %92, %cst_31 : f32
    %94 = vector.broadcast %93 : f32 to vector<8x64xf32>
    %95 = arith.subf %82, %94 : vector<8x64xf32>
    %96 = arith.mulf %95, %95 : vector<8x64xf32>
    %97 = vector.shape_cast %96 : vector<8x64xf32> to vector<1x8x64xf32>
    %cst_32 = arith.constant dense<0.000000e+00> : vector<1xf32>
    %98 = vector.multi_reduction <add>, %97, %cst_32 [1, 2] : vector<1x8x64xf32> to vector<1xf32>
    %99 = vector.shape_cast %98 : vector<1xf32> to vector<1x1x1xf32>
    %100 = vector.extract %99[0, 0, 0] : f32 from vector<1x1x1xf32>
    %cst_33 = arith.constant 0.001953125 : f32
    %101 = arith.mulf %100, %cst_33 : f32
    %cst_34 = arith.constant 9.99999974E-6 : f32
    %102 = arith.addf %101, %cst_34 : f32
    %103 = math.rsqrt %102 : f32
    %104 = vector.broadcast %103 : f32 to vector<8x64xf32>
    %105 = arith.mulf %95, %104 : vector<8x64xf32>
    %106 = arith.mulf %105, %85 : vector<8x64xf32>
    %107 = arith.addf %106, %88 : vector<8x64xf32>
    %108 = arith.addf %3, %107 : vector<8x64xf32>
    %109 = arith.index_cast %arg1 : i32 to index
    %c0_35 = arith.constant 0 : index
    %c0_36 = arith.constant 0 : index
    %110 = vector.load %arg10[%109, %c0_35, %c0_36] : memref<1x8x8xbf16, #tpu.memory_space<vmem>>, vector<1x8x8xbf16>
    %111 = vector.shape_cast %110 : vector<1x8x8xbf16> to vector<8x8xbf16>
    %112 = arith.truncf %108 : vector<8x64xf32> to vector<8x64xbf16>
    %cst_37 = arith.constant dense<0.000000e+00> : vector<8x64xf32>
    %113 = tpu.matmul %111, %112, %cst_37 {dimension_numbers = #tpu.dot_dimension_numbers<[1], [0], [0], [1], [0, 0, 1, 1], [], []>} : vector<8x8xbf16>, vector<8x64xbf16>, vector<8x64xf32> -> vector<8x64xf32>
    %114 = arith.index_cast %arg1 : i32 to index
    %c0_38 = arith.constant 0 : index
    %c0_39 = arith.constant 0 : index
    %115 = vector.load %arg11[%114, %c0_38, %c0_39] : memref<1x8x1xf32, #tpu.memory_space<vmem>>, vector<1x8x1xf32>
    %116 = vector.shape_cast %115 : vector<1x8x1xf32> to vector<8x1xf32>
    %117 = vector.broadcast %116 : vector<8x1xf32> to vector<8x64xf32>
    %118 = arith.addf %113, %117 : vector<8x64xf32>
    %cst_40 = arith.constant 5.000000e-01 : f32
    %119 = vector.broadcast %cst_40 : f32 to vector<8x64xf32>
    %120 = arith.mulf %119, %118 : vector<8x64xf32>
    %cst_41 = arith.constant 4.471500e-02 : f32
    %121 = vector.broadcast %cst_41 : f32 to vector<8x64xf32>
    %122 = arith.mulf %121, %118 : vector<8x64xf32>
    %123 = arith.mulf %122, %118 : vector<8x64xf32>
    %124 = arith.mulf %123, %118 : vector<8x64xf32>
    %125 = arith.addf %118, %124 : vector<8x64xf32>
    %cst_42 = arith.constant 0.797884583 : f32
    %126 = vector.broadcast %cst_42 : f32 to vector<8x64xf32>
    %127 = arith.mulf %126, %125 : vector<8x64xf32>
    %128 = math.tanh %127 : vector<8x64xf32>
    %cst_43 = arith.constant 1.000000e+00 : f32
    %129 = vector.broadcast %cst_43 : f32 to vector<8x64xf32>
    %130 = arith.addf %129, %128 : vector<8x64xf32>
    %131 = arith.mulf %120, %130 : vector<8x64xf32>
    %132 = arith.index_cast %arg1 : i32 to index
    %c0_44 = arith.constant 0 : index
    %c0_45 = arith.constant 0 : index
    %133 = vector.load %arg12[%132, %c0_44, %c0_45] : memref<1x8x8xbf16, #tpu.memory_space<vmem>>, vector<1x8x8xbf16>
    %134 = vector.shape_cast %133 : vector<1x8x8xbf16> to vector<8x8xbf16>
    %135 = arith.truncf %131 : vector<8x64xf32> to vector<8x64xbf16>
    %cst_46 = arith.constant dense<0.000000e+00> : vector<8x64xf32>
    %136 = tpu.matmul %134, %135, %cst_46 {dimension_numbers = #tpu.dot_dimension_numbers<[1], [0], [0], [1], [0, 0, 1, 1], [], []>} : vector<8x8xbf16>, vector<8x64xbf16>, vector<8x64xf32> -> vector<8x64xf32>
    %137 = arith.index_cast %arg1 : i32 to index
    %c0_47 = arith.constant 0 : index
    %c0_48 = arith.constant 0 : index
    %138 = vector.load %arg13[%137, %c0_47, %c0_48] : memref<1x8x1xf32, #tpu.memory_space<vmem>>, vector<1x8x1xf32>
    %139 = vector.shape_cast %138 : vector<1x8x1xf32> to vector<8x1xf32>
    %140 = vector.broadcast %139 : vector<8x1xf32> to vector<8x64xf32>
    %141 = arith.addf %136, %140 : vector<8x64xf32>
    %142 = arith.index_cast %arg1 : i32 to index
    %c0_49 = arith.constant 0 : index
    %c0_50 = arith.constant 0 : index
    %143 = vector.load %arg14[%142, %c0_49, %c0_50] : memref<1x8x64xf32, #tpu.memory_space<vmem>>, vector<1x8x64xf32>
    %144 = vector.shape_cast %143 : vector<1x8x64xf32> to vector<8x64xf32>
    %145 = arith.index_cast %arg1 : i32 to index
    %c0_51 = arith.constant 0 : index
    %c0_52 = arith.constant 0 : index
    %146 = vector.load %arg15[%145, %c0_51, %c0_52] : memref<1x8x64xf32, #tpu.memory_space<vmem>>, vector<1x8x64xf32>
    %147 = vector.shape_cast %146 : vector<1x8x64xf32> to vector<8x64xf32>
    %148 = vector.shape_cast %141 : vector<8x64xf32> to vector<1x8x64xf32>
    %cst_53 = arith.constant dense<0.000000e+00> : vector<1xf32>
    %149 = vector.multi_reduction <add>, %148, %cst_53 [1, 2] : vector<1x8x64xf32> to vector<1xf32>
    %150 = vector.shape_cast %149 : vector<1xf32> to vector<1x1x1xf32>
    %151 = vector.extract %150[0, 0, 0] : f32 from vector<1x1x1xf32>
    %cst_54 = arith.constant 0.001953125 : f32
    %152 = arith.mulf %151, %cst_54 : f32
    %153 = vector.broadcast %152 : f32 to vector<8x64xf32>
    %154 = arith.subf %141, %153 : vector<8x64xf32>
    %155 = arith.mulf %154, %154 : vector<8x64xf32>
    %156 = vector.shape_cast %155 : vector<8x64xf32> to vector<1x8x64xf32>
    %cst_55 = arith.constant dense<0.000000e+00> : vector<1xf32>
    %157 = vector.multi_reduction <add>, %156, %cst_55 [1, 2] : vector<1x8x64xf32> to vector<1xf32>
    %158 = vector.shape_cast %157 : vector<1xf32> to vector<1x1x1xf32>
    %159 = vector.extract %158[0, 0, 0] : f32 from vector<1x1x1xf32>
    %cst_56 = arith.constant 0.001953125 : f32
    %160 = arith.mulf %159, %cst_56 : f32
    %cst_57 = arith.constant 9.99999974E-6 : f32
    %161 = arith.addf %160, %cst_57 : f32
    %162 = math.rsqrt %161 : f32
    %163 = vector.broadcast %162 : f32 to vector<8x64xf32>
    %164 = arith.mulf %154, %163 : vector<8x64xf32>
    %165 = arith.mulf %164, %144 : vector<8x64xf32>
    %166 = arith.addf %165, %147 : vector<8x64xf32>
    %167 = arith.addf %4, %166 : vector<8x64xf32>
    %c0_58 = arith.constant 0 : index
    %c0_59 = arith.constant 0 : index
    %168 = vector.load %arg17[%c0_58, %c0_59] : memref<8x64xf32, #tpu.memory_space<vmem>>, vector<8x64xf32>
    tpu.vector_store %arg17[%c0_58, %c0_59], %108 {strides = array<i32>} : memref<8x64xf32, #tpu.memory_space<vmem>>, vector<8x64xf32>,
    %c0_60 = arith.constant 0 : index
    %c0_61 = arith.constant 0 : index
    %169 = vector.load %arg18[%c0_60, %c0_61] : memref<8x64xf32, #tpu.memory_space<vmem>>, vector<8x64xf32>
    tpu.vector_store %arg18[%c0_60, %c0_61], %167 {strides = array<i32>} : memref<8x64xf32, #tpu.memory_space<vmem>>, vector<8x64xf32>,
    %c0_i32_62 = arith.constant 0 : i32
    %170 = arith.cmpi eq, %arg1, %c0_i32_62 : i32
    %171 = arith.extui %170 : i1 to i32
    %c0_i32_63 = arith.constant 0 : i32
    %172 = arith.cmpi ne, %171, %c0_i32_63 : i32
    scf.if %172 {
      %173 = arith.addf %108, %167 : vector<8x64xf32>
      %cst_64 = arith.constant 5.000000e-01 : f32
      %174 = vector.broadcast %cst_64 : f32 to vector<8x64xf32>
      %175 = arith.mulf %173, %174 : vector<8x64xf32>
      %c0_65 = arith.constant 0 : index
      %c0_66 = arith.constant 0 : index
      %c0_67 = arith.constant 0 : index
      %176 = vector.load %arg16[%c0_65, %c0_66, %c0_67] : memref<1x8x64xf32, #tpu.memory_space<vmem>>, vector<1x8x64xf32>
      %177 = vector.shape_cast %176 : vector<1x8x64xf32> to vector<8x64xf32>
      %178 = vector.shape_cast %175 : vector<8x64xf32> to vector<1x8x64xf32>
      tpu.vector_store %arg16[%c0_65, %c0_66, %c0_67], %178 {strides = array<i32>} : memref<1x8x64xf32, #tpu.memory_space<vmem>>, vector<1x8x64xf32>,
    } else {
    }
    return
  }
  func.func @transform_0(%arg0: i32, %arg1: i32) -> (i32, i32, i32) {
    %c0_i32 = arith.constant 0 : i32
    %c0_i32_0 = arith.constant 0 : i32
    %c0_i32_1 = arith.constant 0 : i32
    return %arg0, %c0_i32, %c0_i32_0 : i32, i32, i32
  }
  func.func @transform_1(%arg0: i32, %arg1: i32) -> (i32, i32) {
    %c0_i32 = arith.constant 0 : i32
    %c0_i32_0 = arith.constant 0 : i32
    %c0_i32_1 = arith.constant 0 : i32
    return %c0_i32, %c0_i32_0 : i32, i32
  }
  func.func @transform_2(%arg0: i32, %arg1: i32) -> (i32, i32, i32) {
    %c0_i32 = arith.constant 0 : i32
    %c0_i32_0 = arith.constant 0 : i32
    %c0_i32_1 = arith.constant 0 : i32
    %c0_i32_2 = arith.constant 0 : i32
    return %c0_i32, %c0_i32_0, %c0_i32_1 : i32, i32, i32
  }
  func.func @transform_3(%arg0: i32, %arg1: i32) -> (i32, i32, i32) {
    %c0_i32 = arith.constant 0 : i32
    %c0_i32_0 = arith.constant 0 : i32
    %c0_i32_1 = arith.constant 0 : i32
    %c0_i32_2 = arith.constant 0 : i32
    return %c0_i32, %c0_i32_0, %c0_i32_1 : i32, i32, i32
  }
  func.func @transform_4(%arg0: i32, %arg1: i32) -> (i32, i32, i32) {
    %c0_i32 = arith.constant 0 : i32
    %c0_i32_0 = arith.constant 0 : i32
    %c0_i32_1 = arith.constant 0 : i32
    %c0_i32_2 = arith.constant 0 : i32
    return %c0_i32, %c0_i32_0, %c0_i32_1 : i32, i32, i32
  }
  func.func @transform_5(%arg0: i32, %arg1: i32) -> (i32, i32, i32) {
    %c0_i32 = arith.constant 0 : i32
    %c0_i32_0 = arith.constant 0 : i32
    %c0_i32_1 = arith.constant 0 : i32
    %c0_i32_2 = arith.constant 0 : i32
    return %c0_i32, %c0_i32_0, %c0_i32_1 : i32, i32, i32
  }
  func.func @transform_6(%arg0: i32, %arg1: i32) -> (i32, i32, i32) {
    %c0_i32 = arith.constant 0 : i32
    %c0_i32_0 = arith.constant 0 : i32
    %c0_i32_1 = arith.constant 0 : i32
    %c0_i32_2 = arith.constant 0 : i32
    return %c0_i32, %c0_i32_0, %c0_i32_1 : i32, i32, i32
  }
  func.func @transform_7(%arg0: i32, %arg1: i32) -> (i32, i32, i32) {
    %c0_i32 = arith.constant 0 : i32
    %c0_i32_0 = arith.constant 0 : i32
    %c0_i32_1 = arith.constant 0 : i32
    %c0_i32_2 = arith.constant 0 : i32
    return %c0_i32, %c0_i32_0, %c0_i32_1 : i32, i32, i32
  }
  func.func @transform_8(%arg0: i32, %arg1: i32) -> (i32, i32, i32) {
    %c0_i32 = arith.constant 0 : i32
    %c0_i32_0 = arith.constant 0 : i32
    %c0_i32_1 = arith.constant 0 : i32
    %c0_i32_2 = arith.constant 0 : i32
    return %c0_i32, %c0_i32_0, %c0_i32_1 : i32, i32, i32
  }
  func.func @transform_9(%arg0: i32, %arg1: i32) -> (i32, i32, i32) {
    %c0_i32 = arith.constant 0 : i32
    %c0_i32_0 = arith.constant 0 : i32
    %c0_i32_1 = arith.constant 0 : i32
    %c0_i32_2 = arith.constant 0 : i32
    return %c0_i32, %c0_i32_0, %c0_i32_1 : i32, i32, i32
  }
  func.func @transform_10(%arg0: i32, %arg1: i32) -> (i32, i32, i32) {
    %c0_i32 = arith.constant 0 : i32
    %c0_i32_0 = arith.constant 0 : i32
    %c0_i32_1 = arith.constant 0 : i32
    %c0_i32_2 = arith.constant 0 : i32
    return %c0_i32, %c0_i32_0, %c0_i32_1 : i32, i32, i32
  }
  func.func @transform_11(%arg0: i32, %arg1: i32) -> (i32, i32, i32) {
    %c0_i32 = arith.constant 0 : i32
    %c0_i32_0 = arith.constant 0 : i32
    %c0_i32_1 = arith.constant 0 : i32
    %c0_i32_2 = arith.constant 0 : i32
    return %c0_i32, %c0_i32_0, %c0_i32_1 : i32, i32, i32
  }
  func.func @transform_12(%arg0: i32, %arg1: i32) -> (i32, i32, i32) {
    %c0_i32 = arith.constant 0 : i32
    %c0_i32_0 = arith.constant 0 : i32
    %c0_i32_1 = arith.constant 0 : i32
    %c0_i32_2 = arith.constant 0 : i32
    return %c0_i32, %c0_i32_0, %c0_i32_1 : i32, i32, i32
  }
  func.func @transform_13(%arg0: i32, %arg1: i32) -> (i32, i32, i32) {
    %c0_i32 = arith.constant 0 : i32
    %c0_i32_0 = arith.constant 0 : i32
    %c0_i32_1 = arith.constant 0 : i32
    %c0_i32_2 = arith.constant 0 : i32
    return %c0_i32, %c0_i32_0, %c0_i32_1 : i32, i32, i32
  }
  func.func @transform_14(%arg0: i32, %arg1: i32) -> (i32, i32, i32) {
    %c0_i32 = arith.constant 0 : i32
    %c0_i32_0 = arith.constant 0 : i32
    %c0_i32_1 = arith.constant 0 : i32
    return %arg0, %c0_i32, %c0_i32_0 : i32, i32, i32
  }
}

</mosaic_0001>

<bundles_post_ra>
// kernel: swin_res2mlp_forward.4
= control target key start
LH: loop header
LB: loop body
LE: loop exit
PB: predicated region body
PF: predicated region fallthrough
CT: control target
= control target key end

     0   :  { %s339_s12 = smov 0   ;;  %s362_s0 = inlined_call_operand.vmem [shape: bf16[2,4,64], index: 0, kind: input, shape index: {}]   ;;  %s363_s1 = inlined_call_operand.vmem [shape: bf16[8,4], index: 1, kind: input, shape index: {}]   ;;  %s364_s2 = inlined_call_operand.vmem [shape: f32[8,1], index: 2, kind: input, shape index: {}]   ;;  %s365_s3 = inlined_call_operand.vmem [shape: f32[2,8,64], index: 3, kind: output, shape index: {}]  }
   0x1 LB: > { %s278_s13 = sadd.s32 4294967295, %s314_s12   ;;  %p282_p0 = scmp.ge.s32.totalorder %s314_s12, 1  ;;  %s314_s12 = sphi %s339_s12, %s13_s12  }
   0x2   : > { %p136_p1 = scmp.lt.s32.totalorder %s314_s12, 3 }
   0x4   : > { %p137_p2 = pnand %p282_p0, %p136_p1 }
   0x5   : > { %p158_p3 = scmp.lt.s32.totalorder (!%p137_p2), %s278_s13, 1 }
   0x6   : > { %140 = sbr.rel (%p137_p2) target bundleno = 218 (0xda), region = 32 }
   0xb   : > { %v316_v0 = vmov 0.0   ;;  %vm317_vm0 = vmmov 0   ;;  %v169_v1 = vld [vmem:[%s364_s2] sm:$0xff]  ;;  %s367_s13 = smov (!%p158_p3, %s278_s13), 1  ;;  %v318_v2 = vmov 0   ;;  %vm179_vm1 = vcmask 1041408  }
   0xc   : > { %290 = vmatprep.subr.bf16.mxu0 %v316_v0  ;;  %292 = vmatprep.mubr.msk.bf16.mxu0 %vm317_vm0, %v316_v0  ;;  %s283_s16 = sshll.u32 %s367_s13, 1  ;;  %v167_v5 = vld [vmem:[%s363_s1] sm:$0xf]  ;;  %vm175_vm2 = vcmask 31744   ;;  %s284_s22 = sshll.u32 %s367_s13, 3  ;;  %vm223_vm3 = vcmask 523264  }
   0xd   : > { %307 = vset.pattern.permute.xlu0 %v318_v2  ;;  %s161_s19 = scalar_lea.vmem %s362_s0, %s283_s16  ;;  %s165_s25 = scalar_lea.vmem %s365_s3, %s284_s22 }
   0xe   : > { %172 = vperm.xlu0 %307, %v169_v1   ;;  %v168_v3 = vld [vmem:[%s161_s19] sm:$0x3] }
   0xf   : > { %v181_v4 = vsel %vm179_vm1, %v168_v3, 0 }
  0x10   : > { %291 = vmatpush3.bf16.msra.mxu0 %v181_v4 }
  0x13   : > { %293 = vmatmul.mubr.msk.bf16.vlgmr.msra.gmra.mxu0 %vm175_vm2, %v167_v5 }
  0x89   : > { %v173_v6 = vpop.permute.xlu0 %172 }
  0xd3   : > { %v217_v7 = vpop.f32.mrf.mxu0 }
  0xd4   : > { %v218_v8 = vadd.f32 %v217_v7, %v173_v6 }
  0xd5   : > { %v294_v9 = vpop.f32.mrf.mxu0 }
  0xd6   : > { %224 = vst.msk [vmem:[%s165_s25] sm:$0xff] %vm223_vm3, %v218_v8 }
  0xd7   : > { %v220_v10 = vpop.f32.mrf.mxu0 }
  0xd9   : > { %v295_v11 = vpop.f32.mrf.mxu0 }
  0xda PF: > { %s13_s12 = sadd.s32 1, %s314_s12  }
  0xdb   : > { %p10_p4 = scmp.ge.s32.totalorder %s13_s12, 4  }
  0xdd   :  { %12 = sbr.rel (!%p10_p4) target bundleno = 1 (0x1), region = 62 }

// kernel: swin_res2mlp_forward.3
= control target key start
LH: loop header
LB: loop body
LE: loop exit
PB: predicated region body
PF: predicated region fallthrough
CT: control target
= control target key end

     0   :  { %s1402_s29 = smov 0   ;;  %s1404_s30 = smov 0   ;;  %s1630_s0 = inlined_call_operand.vmem [shape: f32[2,4,256], index: 0, kind: input, shape index: {}]   ;;  %s1631_s1 = inlined_call_operand.vmem [shape: s32[2,256], index: 1, kind: input, shape index: {}]   ;;  %s1632_s2 = inlined_call_operand.vmem [shape: bf16[2,4,4], index: 2, kind: input, shape index: {}]   ;;  %s1633_s3 = inlined_call_operand.vmem [shape: f32[2,4,1], index: 3, kind: input, shape index: {}]   ;;  %s1634_s4 = inlined_call_operand.vmem [shape: bf16[2,4,4], index: 4, kind: input, shape index: {}]   ;;  %s1635_s5 = inlined_call_operand.vmem [shape: f32[2,4,1], index: 5, kind: input, shape index: {}]   ;;  %s1636_s6 = inlined_call_operand.vmem [shape: f32[2,4,256], index: 6, kind: input, shape index: {}]   ;;  %s1637_s7 = inlined_call_operand.vmem [shape: f32[2,4,256], index: 7, kind: input, shape index: {}]   ;;  %s1638_s8 = inlined_call_operand.vmem [shape: bf16[2,4,4], index: 8, kind: input, shape index: {}]   ;;  %s1639_s9 = inlined_call_operand.vmem [shape: f32[2,4,1], index: 9, kind: input, shape index: {}]   ;;  %s1640_s10 = inlined_call_operand.vmem [shape: bf16[2,4,4], index: 10, kind: input, shape index: {}]   ;;  %s1641_s11 = inlined_call_operand.vmem [shape: f32[2,4,1], index: 11, kind: input, shape index: {}]   ;;  %s1642_s12 = inlined_call_operand.vmem [shape: f32[2,4,256], index: 12, kind: input, shape index: {}]   ;;  %s1643_s13 = inlined_call_operand.vmem [shape: f32[2,4,256], index: 13, kind: input, shape index: {}]   ;;  %s1644_s14 = inlined_call_operand.vmem [shape: f32[2,4,256], index: 14, kind: output, shape index: {}]  }
   0x1   :  { %1645 = sst [smem:[#allocation5_spill]] %s1630_s0  ;;  %s1406_s15 = smov 0  }
   0x2   :  { %1646 = sst [smem:[#allocation6_spill]] %s1632_s2  ;;  %s1408_s16 = smov 0  }
   0x3   :  { %s1410_s17 = smov 0  }
   0x4 LB: > { %s33_s18 = sadd.s32 1, %s1312_s15  ;;  %s36_s19 = sadd.s32 1, %s1316_s16  ;;  %s1320_s17 = sphi %s1410_s17, %s24_s17   ;;  %s1316_s16 = sphi %s1408_s16, %s1660_s16   ;;  %s1312_s15 = sphi %s1406_s15, %s1659_s15   ;;  %s1308_s30 = sphi %s1404_s30, %s1658_s30   ;;  %s1304_s29 = sphi %s1402_s29, %s1657_s29  }
   0x5   : > { %p34_p0 = scmp.ge.s32.totalorder %s33_s18, 2  ;;  %p1169_p1 = scmp.ge.s32.totalorder %s1320_s17, 1 }
   0x6   : > { %p424_p2 = scmp.lt.s32.totalorder %s1320_s17, 5 }
   0x7   : > { %s1662_s18 = smov (%p34_p0, %s33_s18), 0  ;;  %s1664_s19 = smov (!%p34_p0, %s36_s19), %s1316_s16 }
   0x8   : > { %p425_p3 = pnand %p1169_p1, %p424_p2  ;;  %p38_p4 = scmp.ge.s32.totalorder %s1664_s19, 2 }
   0x9   : > { %p470_p5 = scmp.lt.s32.totalorder (!%p425_p3), %s1308_s30, 1  ;;  %s1647_s0 = sld [smem:[#allocation5_spill]] (!%p425_p3) }
   0xa   : > { %s1666_s19 = smov (%p38_p4, %s1664_s19), 0  ;;  %428 = sbr.rel (%p425_p3) target bundleno = 2028 (0x7ec), region = 76 }
   0xb   : > { %p1174_p6 = scmp.ne.s32.totalorder (!%p425_p3), %s1304_s29, 0 }
   0xf   : > { %s1668_s30 = smov (!%p470_p5, %s1308_s30), 1  ;;  %484 = sbr.rel (%p1174_p6) target bundleno = 27 (0x1b), region = 80 }
  0x10   : > { %s1199_s20 = sshll.u32 %s1668_s30, 3 }
  0x11   : > { %s474_s23 = scalar_lea.vmem %s1647_s0, %s1199_s20  ;;  %s1440_s26 = scalar_lea.vmem %s1644_s14, %s1199_s20 }
  0x14   : > { %v485_v0 = vld [vmem:[%s474_s23] ss:$4 sm:$0x3]  ;;  %v486_v1 = vlaneseq  ;;  %v1175_v2 = vld [vmem:[%s474_s23 + $0x2] ss:$4 sm:$0x3] }
  0x15   : > { %v1176_v3 = vld [vmem:[%s474_s23 + $0x1] ss:$4 sm:$0x3]  ;;  %v1177_v4 = vld [vmem:[%s474_s23 + $0x3] ss:$4 sm:$0x3] }
  0x16   : > { %vm488_vm0 = vcmp.lt.s32.totalorder %v486_v1, 256 }
  0x17   : > { %490 = vst.msk [vmem:[#allocation2] ss:$4 sm:$0x3] %vm488_vm0, %v485_v0  ;;  %492 = vst.msk [vmem:[#allocation2 + $0x1] ss:$4 sm:$0x3] %vm488_vm0, %v485_v0 }
  0x18   : > { %495 = vst.msk [vmem:[#allocation3] ss:$4 sm:$0x3] %vm488_vm0, %v1175_v2  ;;  %497 = vst.msk [vmem:[#allocation3 + $0x1] ss:$4 sm:$0x3] %vm488_vm0, %v1175_v2 }
  0x19   : > { %501 = vst.msk [vmem:[#allocation2 + $0x2] ss:$4 sm:$0x3] %vm488_vm0, %v1176_v3  ;;  %503 = vst.msk [vmem:[#allocation2 + $0x3] ss:$4 sm:$0x3] %vm488_vm0, %v1176_v3 }
  0x1a   : > { %507 = vst.msk [vmem:[#allocation3 + $0x2] ss:$4 sm:$0x3] %vm488_vm0, %v1177_v4  ;;  %509 = vst.msk [vmem:[#allocation3 + $0x3] ss:$4 sm:$0x3] %vm488_vm0, %v1177_v4 }
  0x1b PF: > { %vm535_vm1 = vcmask 1041408   ;;  %s1446_s27 = sshll.u32 %s1304_s29, 1  ;;  %s1449_s28 = sshll.u32 %s1304_s29, 2  ;;  %v1322_v8 = vmov 0   ;;  %vm531_vm2 = vcmask 31744   ;;  %v601_v39 = vlaneseq }
  0x1c   : > { %574 = vmatprep.mubr.bf16.mxu0 %v1322_v8  ;;  %1263 = vset.pattern.permute.xlu0 %v1322_v8  ;;  %s524_s21 = scalar_lea.vmem %s1633_s3, %s1449_s28  ;;  %s1648_s2 = sld [smem:[#allocation6_spill]]  ;;  %v512_v40 = vld [vmem:[%s1631_s1] sm:$0xf] }
  0x1d   : > { %v525_v9 = vld [vmem:[%s524_s21] sm:$0xf]  ;;  %792 = vmatprep.mubr.bf16.mxu1 %v1322_v8  ;;  %1264 = vset.pattern.permute.xlu1 %v1322_v8  ;;  %s1323_s25 = smov 112   ;;  %s1324_s30 = smov 16   ;;  %v1490_v41 = vshrl.u32 %v601_v39, 7  ;;  %vm514_vm3 = vcmp.eq.s32.totalorder %v512_v40, 15 }
  0x1e   : > { %528 = vperm.xlu0 %1263, %v525_v9   ;;  %s1325_s20 = smov 127   ;;  %s744_s23 = scalar_lea.vmem %s1635_s5, %s1449_s28  ;;  %vm513_vm4 = vcmp.eq.s32.totalorder %v512_v40, 0  ;;  %v642_v44 = vsel %vm514_vm3, 1, %v1322_v8  ;;  %v609_v56 = vand.u32 127, %v601_v39 }
  0x1f   : > { %v745_v38 = vld [vmem:[%s744_s23] sm:$0xf]  ;;  %v673_v42 = vsub.s32 0, %v1490_v41  ;;  %v677_v43 = vsub.s32 2, %v1490_v41  ;;  %v613_v45 = vsel %vm513_vm4, 1, %v1322_v8  ;;  %v616_v46 = vsub.s32 1, %v1490_v41  ;;  %s870_s21 = scalar_lea.vmem %s1639_s9, %s1449_s28 }
  0x20   : > { %v620_v47 = vsub.s32 3, %v1490_v41  ;;  %vm695_vm5 = vcmp.lt.s32.totalorder %v609_v56, 112  ;;  %vm663_vm8 = vcmp.lt.s32.totalorder %v1490_v41, 3  ;;  %vm668_vm9 = vcmp.lt.s32.totalorder %v609_v56, 16  ;;  %p1196_p7 = scmp.ne.s32.totalorder %s1304_s29, 1 }
  0x21   : > { %v1443_v5 = vld [vmem:[#allocation3] sm:$0xff]  ;;  %v701_v48 = vrot.slane %v642_v44, %v673_v42  ;;  %v705_v49 = vrot.slane %v642_v44, %v677_v43  ;;  %v674_v50 = vrot.slane %v613_v45, %v673_v42  ;;  %v678_v51 = vrot.slane %v613_v45, %v677_v43 }
  0x22   : > { %v519_v6 = vcombine.high %v1443_v5, %v1443_v5  ;;  %v521_v7 = vpack.c.bf16 %v1443_v5, %v1443_v5  ;;  %s516_s24 = scalar_lea.vmem %s1648_s2, %s1446_s27  ;;  %v646_v52 = vrot.slane %v642_v44, %v616_v46  ;;  %v650_v53 = vrot.slane %v642_v44, %v620_v47  ;;  %s950_s2 = scalar_lea.vmem %s1641_s11, %s1449_s28 }
  0x23   : > { %v517_v12 = vld [vmem:[%s516_s24] sm:$0x3]  ;;  %s1326_s24 = smov 1   ;;  %v617_v57 = vrot.slane %v613_v45, %v616_v46  ;;  %v621_v58 = vrot.slane %v613_v45, %v620_v47  ;;  %v709_v59 = vrot.slane %v701_v48, %v673_v42  ;;  %v713_v60 = vrot.slane %v705_v49, %v673_v42  ;;  %s863_s28 = scalar_lea.vmem %s1638_s8, %s1446_s27 }
  0x24   : > { %v522_v10 = vpack.c.bf16 %v519_v6, %v519_v6  ;;  %v537_v11 = vsel %vm535_vm1, %v521_v7, 0  ;;  %v682_v61 = vrot.slane %v674_v50, %v673_v42  ;;  %v686_v62 = vrot.slane %v678_v51, %v673_v42 }
  0x25   : > { %v654_v63 = vrot.slane %v646_v52, %v616_v46  ;;  %v658_v0 = vrot.slane %v650_v53, %v616_v46  ;;  %v625_v3 = vrot.slane %v617_v57, %v616_v46  ;;  %v629_v4 = vrot.slane %v621_v58, %v616_v46  ;;  %v871_v53 = vld [vmem:[%s870_s21] sm:$0xf]  ;;  %s1568_s21 = sshll.u32 %s1304_s29, 3 }
  0x26   : > { %1180 = vmatprep.subr.msk.bf16.mxu0 %vm535_vm1, %v522_v10  ;;  %vm714_vm6 = vcmp.eq.s32.totalorder %v709_v59, 1  ;;  %vm1498_vm7 = vcmp.eq.s32.totalorder %v713_v60, 1  ;;  %vm687_vm10 = vcmp.eq.s32.totalorder %v682_v61, 1  ;;  %vm1503_vm11 = vcmp.eq.s32.totalorder %v686_v62, 1 }
  0x27   : > { %557 = vmatpush1.bf16.msra.mxu0 %v537_v11  ;;  %vm639_vm12 = vcmp.lt.s32.totalorder %v609_v56, 127  ;;  %vm659_vm13 = vcmp.eq.s32.totalorder %v654_v63, 1  ;;  %vm1507_vm14 = vcmp.eq.s32.totalorder %v658_v0, 1  ;;  %vm610_vm15 = vcmp.lt.s32.totalorder %v609_v56, 1 }
  0x28   : > { %vm630_vm0 = vcmp.eq.s32.totalorder %v625_v3, 1  ;;  %vm1511_vm3 = vcmp.eq.s32.totalorder %v629_v4, 1  ;;  %vm634_vm4 = vcmp.lt.s32.totalorder %v1490_v41, 2  ;;  %v951_v4 = vld [vmem:[%s950_s2] sm:$0xf]  ;;  %s806_s2 = scalar_lea.vmem %s1637_s7, %s1568_s21 }
  0x2a   : > { %1181 = vmatmul.mubr.msk.bf16.vlgmr.msra.gmra.mxu0 %vm531_vm2, %v517_v12 }
  0x2b   : > { %918 = vmatprep.mubr.bf16.mxu0 %v1322_v8 }
  0x99   : > { %v529_v13 = vpop.permute.xlu0 %528 }
  0xea   : > { %v576_v14 = vpop.f32.mrf.mxu0 }
  0xeb   : > { %v577_v15 = vadd.f32 %v576_v14, %v529_v13 }
  0xec   : > { %v578_v16 = vpop.f32.mrf.mxu0 }
  0xed   : > { %v585_v17 = vmul.f32 0.044715, %v577_v15  ;;  %v579_v18 = vadd.f32 %v578_v16, %v529_v13  ;;  %v583_v31 = vmul.f32 0.5, %v577_v15 }
  0xee   : > { %v580_v19 = vpop.f32.mrf.mxu0 }
  0xef   : > { %v587_v20 = vmul.f32 %v585_v17, %v577_v15  ;;  %v586_v21 = vmul.f32 0.044715, %v579_v18  ;;  %v584_v36 = vmul.f32 0.5, %v579_v18 }
  0xf0   : > { %v581_v22 = vpop.f32.mrf.mxu0 }
  0xf1   : > { %v589_v23 = vmul.f32 %v587_v20, %v577_v15  ;;  %v588_v24 = vmul.f32 %v586_v21, %v579_v18 }
  0xf3   : > { %v591_v25 = vadd.f32 %v589_v23, %v577_v15  ;;  %v590_v26 = vmul.f32 %v588_v24, %v579_v18 }
  0xf5   : > { %v593_v27 = vmul.f32 0.7978846, %v591_v25  ;;  %v592_v28 = vadd.f32 %v590_v26, %v579_v18 }
  0xf7   : > { %1270 = vtanh.f32 %v593_v27  ;;  %v594_v29 = vmul.f32 0.7978846, %v592_v28 }
  0xf9   : > { %1272 = vtanh.f32 %v594_v29 }
 0x104   : > { %v1271_v30 = vpop.eup %1270 }
 0x105   : > { %v597_v32 = vadd.f32 1.0, %v1271_v30 }
 0x106   : > { %v1273_v33 = vpop.eup %1272 }
 0x107   : > { %v1471_v34 = vmul.f32 %v597_v32, %v583_v31  ;;  %v598_v35 = vadd.f32 1.0, %v1273_v33 }
 0x109   : > { %691 = vrot.lane.b32.xlu1 %v1471_v34, %s1323_s25  ;;  %664 = vrot.lane.b32.xlu0 %v1471_v34, %s1324_s30  ;;  %v1475_v37 = vmul.f32 %v598_v35, %v584_v36 }
 0x10d   : > { %635 = vrot.lane.b32.xlu1 %v1471_v34, %s1325_s20  ;;  %693 = vrot.lane.b32.xlu0 %v1475_v37, %s1323_s25  ;;  %s737_s25 = scalar_lea.vmem %s1634_s4, %s1446_s27 }
 0x111   : > { %666 = vrot.lane.b32.xlu1 %v1475_v37, %s1324_s30  ;;  %637 = vrot.lane.b32.xlu0 %v1475_v37, %s1325_s20 }
 0x115   : > { %604 = vrot.lane.b32.xlu1 %v1471_v34, %s1326_s24  ;;  %606 = vrot.lane.b32.xlu0 %v1475_v37, %s1326_s24  ;;  %s946_s24 = scalar_lea.vmem %s1640_s10, %s1446_s27 }
 0x119   : > { %748 = vperm.xlu1 %1264, %v745_v38  }
 0x17b   : > { %v692_v54 = vpop.permute.xlu1 %691  ;;  %v665_v55 = vpop.permute.xlu0 %664 }
 0x17f   : > { %v636_v1 = vpop.permute.xlu1 %635  ;;  %v694_v2 = vpop.permute.xlu0 %693 }
 0x180   : > { %v696_v9 = vsel %vm695_vm5, %v692_v54, %v694_v2  ;;  %v697_v10 = vsel %vm695_vm5, %v694_v2, %v692_v54  ;;  %vm603_vm5 = vcmp.lt.s32.totalorder %v1490_v41, 1 }
 0x181   : > { %v716_v19 = vsel %vm714_vm6, %v1471_v34, %v696_v9  ;;  %v717_v20 = vsel %vm1498_vm7, %v1475_v37, %v697_v10  ;;  %vm808_vm6 = vcmask 1043456  }
 0x183   : > { %v667_v12 = vpop.permute.xlu1 %666  ;;  %v638_v13 = vpop.permute.xlu0 %637 }
 0x184   : > { %v669_v15 = vsel %vm668_vm9, %v665_v55, %v667_v12  ;;  %v670_v16 = vsel %vm668_vm9, %v667_v12, %v665_v55  ;;  %v640_v17 = vsel %vm639_vm12, %v636_v1, %v638_v13  ;;  %v641_v18 = vsel %vm639_vm12, %v638_v13, %v636_v1 }
 0x185   : > { %v689_v21 = vsel %vm687_vm10, %v1471_v34, %v670_v16  ;;  %v690_v22 = vsel %vm1503_vm11, %v1475_v37, %v669_v15  ;;  %v661_v25 = vsel %vm659_vm13, %v1471_v34, %v640_v17  ;;  %v662_v26 = vsel %vm1507_vm14, %v1475_v37, %v641_v18  ;;  %v807_v17 = vld [vmem:[%s806_s2] sm:$0xff] }
 0x186   : > { %v720_v23 = vsel %vm663_vm8, %v689_v21, %v716_v19  ;;  %v721_v24 = vsel %vm663_vm8, %v690_v22, %v717_v20  ;;  %v853_v22 = vcombine.high %v807_v17, %v807_v17 }
 0x187   : > { %v605_v27 = vpop.permute.xlu1 %604  ;;  %v607_v28 = vpop.permute.xlu0 %606  ;;  %v725_v33 = vsel %vm634_vm4, %v662_v26, %v721_v24  ;;  %v724_v35 = vsel %vm634_vm4, %v661_v25, %v720_v23 }
 0x188   : > { %v611_v29 = vsel %vm610_vm15, %v605_v27, %v607_v28  ;;  %v612_v30 = vsel %vm610_vm15, %v607_v28, %v605_v27  ;;  %v510_v27 = vld [vmem:[#allocation2] sm:$0xff] }
 0x189   : > { %v632_v31 = vsel %vm630_vm0, %v1471_v34, %v612_v30  ;;  %v633_v32 = vsel %vm1511_vm3, %v1475_v37, %v611_v29  ;;  %v738_v37 = vld [vmem:[%s737_s25] sm:$0x3] }
 0x18a   : > { %v729_v36 = vsel %vm603_vm5, %v633_v32, %v725_v33  ;;  %v728_v38 = vsel %vm603_vm5, %v632_v31, %v724_v35  ;;  %v864_v35 = vld [vmem:[%s863_s28] sm:$0x3] }
 0x18b   : > { %v1205_v39 = vcombine.low %v729_v36, %v729_v36  ;;  %v732_v40 = vcombine.low %v728_v38, %v729_v36 }
 0x18d   : > { %v743_v42 = vpack.c.bf16 %v1205_v39, %v1205_v39  ;;  %v742_v43 = vpack.c.bf16 %v732_v40, %v732_v40 }
 0x18f   : > { %1183 = vmatprep.subr.msk.bf16.mxu1 %vm535_vm1, %v743_v42  ;;  %v755_v34 = vsel %vm535_vm1, %v742_v43, 0 }
 0x190   : > { %775 = vmatpush1.bf16.msra.mxu1 %v755_v34 }
 0x193   : > { %1184 = vmatmul.mubr.msk.bf16.vlgmr.msra.gmra.mxu1 %vm531_vm2, %v738_v37 }
 0x194   : > { %998 = vmatprep.mubr.bf16.mxu1 %v1322_v8  ;;  %v749_v41 = vpop.permute.xlu1 %748 }
 0x253   : > { %v794_v44 = vpop.f32.mrf.mxu1 }
 0x254   : > { %v795_v45 = vadd.f32 %v794_v44, %v749_v41 }
 0x255   : > { %v796_v46 = vpop.f32.mrf.mxu1 }
 0x256   : > { %v797_v47 = vadd.f32 %v796_v46, %v749_v41  ;;  %v809_v49 = vsel %vm808_vm6, %v795_v45, 0.0 }
 0x257   : > { %v798_v48 = vpop.f32.mrf.mxu1 }
 0x258   : > { %v810_v50 = vsel %vm808_vm6, %v797_v47, 0.0 }
 0x259   : > { %v799_v51 = vpop.f32.mrf.mxu1  ;;  %v811_v52 = vadd.f32 %v810_v50, %v809_v49 }
 0x25b   : > { %812 = vadd.xlane.f32.xlu0 %v811_v52 }
 0x271   : > { %874 = vperm.xlu0 %1263, %v871_v53  }
 0x2e4   : > { %v813_v8 = vpop.xlane.xlu0 %812 }
 0x2e5   : > { %v814_v54 = vrot.slane %v813_v8, 4 }
 0x2e7   : > { %v815_v55 = vadd.f32 %v814_v54, %v813_v8 }
 0x2e9   : > { %v816_v56 = vrot.slane %v815_v55, 2 }
 0x2eb   : > { %v817_v57 = vadd.f32 %v816_v56, %v815_v55 }
 0x2ec   : > { %v875_v36 = vpop.permute.xlu0 %874 }
 0x2ed   : > { %v818_v58 = vrot.slane %v817_v57, 1 }
 0x2ef   : > { %v819_v59 = vadd.f32 %v818_v58, %v817_v57 }
 0x2f1   : > { %1206 = vpush %v819_v59 }
 0x322   : > { %s1207_s22 = spop %1206 }
 0x323   : > { %s821_s23 = smul.f32 0.0009765625, %s1207_s22  ;;  %s1008_s22 = scalar_lea.vmem %s1642_s12, %s1568_s21 }
 0x325   : > { %v822_v60 = vstv %s821_s23  ;;  %s803_s23 = scalar_lea.vmem %s1636_s6, %s1568_s21 }
 0x326   : > { %v823_v61 = vsub.f32 %v795_v45, %v822_v60  ;;  %v824_v62 = vsub.f32 %v797_v47, %v822_v60  ;;  %v804_v16 = vld [vmem:[%s803_s23] sm:$0xff] }
 0x327   : > { %v848_v18 = vcombine.high %v804_v16, %v804_v16 }
 0x328   : > { %v825_v63 = vmul.f32 %v823_v61, %v823_v61  ;;  %v826_v0 = vmul.f32 %v824_v62, %v824_v62 }
 0x32a   : > { %v827_v1 = vsel %vm808_vm6, %v825_v63, 0.0  ;;  %v828_v2 = vsel %vm808_vm6, %v826_v0, 0.0 }
 0x32b   : > { %v829_v3 = vadd.f32 %v828_v2, %v827_v1 }
 0x32d   : > { %830 = vadd.xlane.f32.xlu1 %v829_v3 }
 0x33e   : > { %954 = vperm.xlu1 %1264, %v951_v4  }
 0x3b6   : > { %v831_v6 = vpop.xlane.xlu1 %830 }
 0x3b7   : > { %v832_v7 = vrot.slane %v831_v6, 4 }
 0x3b9   : > { %v833_v9 = vadd.f32 %v832_v7, %v831_v6 }
 0x3ba   : > { %v955_v63 = vpop.permute.xlu1 %954 }
 0x3bb   : > { %v834_v10 = vrot.slane %v833_v9, 2 }
 0x3bd   : > { %v835_v11 = vadd.f32 %v834_v10, %v833_v9 }
 0x3bf   : > { %v836_v12 = vrot.slane %v835_v11, 1 }
 0x3c1   : > { %v837_v13 = vadd.f32 %v836_v12, %v835_v11 }
 0x3c3   : > { %1208 = vpush %v837_v13 }
 0x3f4   : > { %s1209_s25 = spop %1208 }
 0x3f5   : > { %s839_s30 = smul.f32 0.0009765625, %s1209_s25 }
 0x3f7   : > { %s840_s20 = sadd.f32 1e-05, %s839_s30 }
 0x3f9   : > { %v841_v14 = vstv %s840_s20 }
 0x3fa   : > { %1274 = vrsqrt.f32 %v841_v14 }
 0x407   : > { %v1275_v15 = vpop.eup %1274 }
 0x408   : > { %1210 = vpush %v1275_v15 }
 0x439   : > { %s1211_s25 = spop %1210 }
 0x43a   : > { %v844_v19 = vstv %s1211_s25 }
 0x43b   : > { %v845_v20 = vmul.f32 %v844_v19, %v823_v61  ;;  %v846_v21 = vmul.f32 %v844_v19, %v824_v62  ;;  %v947_v62 = vld [vmem:[%s946_s24] sm:$0x3] }
 0x43d   : > { %v850_v23 = vmul.f32 %v845_v20, %v804_v16  ;;  %v851_v24 = vmul.f32 %v848_v18, %v846_v21 }
 0x43f   : > { %v855_v25 = vadd.f32 %v850_v23, %v807_v17  ;;  %v856_v26 = vadd.f32 %v853_v22, %v851_v24 }
 0x441   : > { %v859_v28 = vcombine.low %v855_v25, %v856_v26 }
 0x443   : > { %v1578_v29 = vadd.f32 %v859_v28, %v510_v27 }
 0x445   : > { %1066 = vst [vmem:[#allocation2] sm:$0xff] %v1578_v29  ;;  %v866_v30 = vcombine.high %v1578_v29, %v1578_v29  ;;  %v868_v31 = vpack.c.bf16 %v1578_v29, %v1578_v29 }
 0x447   : > { %v869_v32 = vpack.c.bf16 %v866_v30, %v866_v30  ;;  %v881_v33 = vsel %vm535_vm1, %v868_v31, 0 }
 0x449   : > { %1189 = vmatprep.subr.msk.bf16.mxu0 %vm535_vm1, %v869_v32 }
 0x44a   : > { %901 = vmatpush1.bf16.msra.mxu0 %v881_v33 }
 0x44d   : > { %1190 = vmatmul.mubr.msk.bf16.vlgmr.msra.gmra.mxu0 %vm531_vm2, %v864_v35 }
 0x50d   : > { %v920_v38 = vpop.f32.mrf.mxu0 }
 0x50e   : > { %v921_v39 = vadd.f32 %v920_v38, %v875_v36  ;;  %v1009_v38 = vld [vmem:[%s1008_s22] sm:$0xff] }
 0x50f   : > { %v922_v40 = vpop.f32.mrf.mxu0 }
 0x510   : > { %v929_v42 = vmul.f32 0.044715, %v921_v39  ;;  %v923_v43 = vadd.f32 %v922_v40, %v875_v36  ;;  %v927_v53 = vmul.f32 0.5, %v921_v39  ;;  %v1052_v40 = vcombine.high %v1009_v38, %v1009_v38 }
 0x511   : > { %v924_v34 = vpop.f32.mrf.mxu0 }
 0x512   : > { %v931_v37 = vmul.f32 %v929_v42, %v921_v39  ;;  %v930_v41 = vmul.f32 0.044715, %v923_v43  ;;  %v928_v55 = vmul.f32 0.5, %v923_v43 }
 0x513   : > { %v925_v44 = vpop.f32.mrf.mxu0 }
 0x514   : > { %v933_v45 = vmul.f32 %v931_v37, %v921_v39  ;;  %v932_v46 = vmul.f32 %v930_v41, %v923_v43 }
 0x516   : > { %v934_v47 = vmul.f32 %v932_v46, %v923_v43  ;;  %v935_v48 = vadd.f32 %v933_v45, %v921_v39 }
 0x518   : > { %v936_v49 = vadd.f32 %v934_v47, %v923_v43  ;;  %v937_v50 = vmul.f32 0.7978846, %v935_v48 }
 0x51a   : > { %v938_v51 = vmul.f32 0.7978846, %v936_v49  ;;  %1276 = vtanh.f32 %v937_v50 }
 0x51c   : > { %1278 = vtanh.f32 %v938_v51 }
 0x527   : > { %v1277_v52 = vpop.eup %1276 }
 0x528   : > { %v941_v8 = vadd.f32 1.0, %v1277_v52 }
 0x529   : > { %v1279_v54 = vpop.eup %1278 }
 0x52a   : > { %v942_v56 = vadd.f32 1.0, %v1279_v54  ;;  %v943_v57 = vmul.f32 %v941_v8, %v927_v53 }
 0x52c   : > { %v944_v58 = vmul.f32 %v942_v56, %v928_v55  ;;  %v948_v59 = vpack.c.bf16 %v943_v57, %v943_v57 }
 0x52e   : > { %v949_v60 = vpack.c.bf16 %v944_v58, %v944_v58  ;;  %v961_v61 = vsel %vm535_vm1, %v948_v59, 0 }
 0x530   : > { %1192 = vmatprep.subr.msk.bf16.mxu1 %vm535_vm1, %v949_v60 }
 0x531   : > { %981 = vmatpush1.bf16.msra.mxu1 %v961_v61 }
 0x534   : > { %1193 = vmatmul.mubr.msk.bf16.vlgmr.msra.gmra.mxu1 %vm531_vm2, %v947_v62 }
 0x5f4   : > { %v1000_v0 = vpop.f32.mrf.mxu1 }
 0x5f5   : > { %v1001_v1 = vadd.f32 %v1000_v0, %v955_v63 }
 0x5f6   : > { %v1002_v2 = vpop.f32.mrf.mxu1 }
 0x5f7   : > { %v1003_v3 = vadd.f32 %v1002_v2, %v955_v63  ;;  %v1013_v6 = vsel %vm808_vm6, %v1001_v1, 0.0 }
 0x5f8   : > { %v1004_v4 = vpop.f32.mrf.mxu1 }
 0x5f9   : > { %v1014_v7 = vsel %vm808_vm6, %v1003_v3, 0.0 }
 0x5fa   : > { %v1005_v9 = vpop.f32.mrf.mxu1  ;;  %v1015_v10 = vadd.f32 %v1014_v7, %v1013_v6 }
 0x5fc   : > { %1016 = vadd.xlane.f32.xlu0 %v1015_v10 }
 0x685   : > { %v1017_v11 = vpop.xlane.xlu0 %1016 }
 0x686   : > { %v1018_v12 = vrot.slane %v1017_v11, 4 }
 0x688   : > { %v1019_v13 = vadd.f32 %v1018_v12, %v1017_v11 }
 0x68a   : > { %v1020_v14 = vrot.slane %v1019_v13, 2 }
 0x68c   : > { %v1021_v15 = vadd.f32 %v1020_v14, %v1019_v13 }
 0x68e   : > { %v1022_v16 = vrot.slane %v1021_v15, 1 }
 0x690   : > { %v1023_v17 = vadd.f32 %v1022_v16, %v1021_v15 }
 0x692   : > { %1212 = vpush %v1023_v17 }
 0x6c3   : > { %s1213_s27 = spop %1212 }
 0x6c4   : > { %s1025_s0 = smul.f32 0.0009765625, %s1213_s27  ;;  %s1011_s27 = scalar_lea.vmem %s1643_s13, %s1568_s21 }
 0x6c5   : > { %v1012_v39 = vld [vmem:[%s1011_s27] sm:$0xff] }
 0x6c6   : > { %v1026_v18 = vstv %s1025_s0  ;;  %v1057_v37 = vcombine.high %v1012_v39, %v1012_v39 }
 0x6c7   : > { %v1027_v19 = vsub.f32 %v1001_v1, %v1026_v18  ;;  %v1028_v20 = vsub.f32 %v1003_v3, %v1026_v18 }
 0x6c9   : > { %v1029_v21 = vmul.f32 %v1027_v19, %v1027_v19  ;;  %v1030_v22 = vmul.f32 %v1028_v20, %v1028_v20 }
 0x6cb   : > { %v1031_v23 = vsel %vm808_vm6, %v1029_v21, 0.0  ;;  %v1032_v24 = vsel %vm808_vm6, %v1030_v22, 0.0 }
 0x6cc   : > { %v1033_v25 = vadd.f32 %v1032_v24, %v1031_v23 }
 0x6ce   : > { %1034 = vadd.xlane.f32.xlu1 %v1033_v25 }
 0x757   : > { %v1035_v26 = vpop.xlane.xlu1 %1034 }
 0x758   : > { %v1036_v27 = vrot.slane %v1035_v26, 4 }
 0x75a   : > { %v1037_v28 = vadd.f32 %v1036_v27, %v1035_v26 }
 0x75c   : > { %v1038_v30 = vrot.slane %v1037_v28, 2 }
 0x75e   : > { %v1039_v31 = vadd.f32 %v1038_v30, %v1037_v28 }
 0x760   : > { %v1040_v32 = vrot.slane %v1039_v31, 1 }
 0x762   : > { %v1041_v33 = vadd.f32 %v1040_v32, %v1039_v31 }
 0x764   : > { %1214 = vpush %v1041_v33 }
 0x795   : > { %s1215_s2 = spop %1214 }
 0x796   : > { %s1043_s25 = smul.f32 0.0009765625, %s1215_s2 }
 0x798   : > { %s1044_s30 = sadd.f32 1e-05, %s1043_s25 }
 0x79a   : > { %v1045_v35 = vstv %s1044_s30 }
 0x79b   : > { %1280 = vrsqrt.f32 %v1045_v35 }
 0x7a8   : > { %v1281_v36 = vpop.eup %1280 }
 0x7a9   : > { %1216 = vpush %v1281_v36 }
 0x7da   : > { %s1217_s0 = spop %1216 }
 0x7db   : > { %v1048_v42 = vstv %s1217_s0 }
 0x7dc   : > { %v1049_v43 = vmul.f32 %v1048_v42, %v1027_v19  ;;  %v1050_v34 = vmul.f32 %v1048_v42, %v1028_v20 }
 0x7de   : > { %v1054_v41 = vmul.f32 %v1049_v43, %v1009_v38  ;;  %v1055_v44 = vmul.f32 %v1052_v40, %v1050_v34 }
 0x7e0   : > { %v1059_v45 = vadd.f32 %v1054_v41, %v1012_v39  ;;  %v1060_v46 = vadd.f32 %v1057_v37, %v1055_v44 }
 0x7e2   : > { %v1063_v47 = vcombine.low %v1059_v45, %v1060_v46  ;;  %1071 = sbr.rel (%p1196_p7) target bundleno = 2028 (0x7ec), region = 84 }
 0x7e4   : > { %v1065_v48 = vadd.f32 %v1063_v47, %v1443_v5 }
 0x7e6   : > { %1067 = vst [vmem:[#allocation3] sm:$0xff] %v1065_v48 }
 0x7e7   : > { %v1072_v49 = vadd.f32 %v1065_v48, %v1578_v29 }
 0x7e9   : > { %v1073_v50 = vmul.f32 0.5, %v1072_v49 }
 0x7eb   : > { %1074 = vst [vmem:[%s1440_s26] sm:$0xff] %v1073_v50 }
 0x7ec PF: > { %s24_s17 = sadd.s32 1, %s1320_s17   ;;  %s1657_s29 = smov %s1312_s15 }
 0x7ed   : > { %p21_p8 = scmp.ge.s32.totalorder %s24_s17, 6   ;;  %s1658_s30 = smov %s1316_s16 }
 0x7ee   : > { %s1659_s15 = smov %s1662_s18  ;;  %s1660_s16 = smov %s1666_s19 }
 0x7ef   :  { %23 = sbr.rel (!%p21_p8) target bundleno = 4 (0x4), region = 135 }

// kernel: swin_res2mlp_forward.5
= control target key start
LH: loop header
LB: loop body
LE: loop exit
PB: predicated region body
PF: predicated region fallthrough
CT: control target
= control target key end

     0   :  { %s1197_s29 = smov 0   ;;  %s1199_s30 = smov 0   ;;  %s1345_s0 = inlined_call_operand.vmem [shape: f32[2,8,64], index: 0, kind: input, shape index: {}]   ;;  %s1346_s1 = inlined_call_operand.vmem [shape: s32[2,64], index: 1, kind: input, shape index: {}]   ;;  %s1347_s2 = inlined_call_operand.vmem [shape: bf16[1,8,8], index: 2, kind: input, shape index: {}]   ;;  %s1348_s3 = inlined_call_operand.vmem [shape: f32[1,8,1], index: 3, kind: input, shape index: {}]   ;;  %s1349_s4 = inlined_call_operand.vmem [shape: bf16[1,8,8], index: 4, kind: input, shape index: {}]   ;;  %s1350_s5 = inlined_call_operand.vmem [shape: f32[1,8,1], index: 5, kind: input, shape index: {}]   ;;  %s1351_s6 = inlined_call_operand.vmem [shape: f32[1,8,64], index: 6, kind: input, shape index: {}]   ;;  %s1352_s7 = inlined_call_operand.vmem [shape: f32[1,8,64], index: 7, kind: input, shape index: {}]   ;;  %s1353_s8 = inlined_call_operand.vmem [shape: bf16[1,8,8], index: 8, kind: input, shape index: {}]   ;;  %s1354_s9 = inlined_call_operand.vmem [shape: f32[1,8,1], index: 9, kind: input, shape index: {}]   ;;  %s1355_s10 = inlined_call_operand.vmem [shape: bf16[1,8,8], index: 10, kind: input, shape index: {}]   ;;  %s1356_s11 = inlined_call_operand.vmem [shape: f32[1,8,1], index: 11, kind: input, shape index: {}]   ;;  %s1357_s12 = inlined_call_operand.vmem [shape: f32[1,8,64], index: 12, kind: input, shape index: {}]   ;;  %s1358_s13 = inlined_call_operand.vmem [shape: f32[1,8,64], index: 13, kind: input, shape index: {}]   ;;  %s1359_s14 = inlined_call_operand.vmem [shape: f32[2,8,64], index: 14, kind: output, shape index: {}]  }
   0x1   :  { %s1201_s15 = smov 0  }
   0x2 LB: > { %s36_s16 = sadd.s32 1, %s1108_s30  ;;  %p995_p0 = scmp.ge.s32.totalorder %s1112_s15, 1  ;;  %s1112_s15 = sphi %s1201_s15, %s24_s15   ;;  %s1108_s30 = sphi %s1199_s30, %s1361_s30   ;;  %s1104_s29 = sphi %s1197_s29, %s1360_s29  }
   0x3   : > { %p38_p1 = scmp.ge.s32.totalorder %s36_s16, 2  ;;  %p423_p2 = scmp.lt.s32.totalorder %s1112_s15, 3 }
   0x5   : > { %s1363_s16 = smov (%p38_p1, %s36_s16), 0  ;;  %p424_p3 = pnand %p995_p0, %p423_p2 }
   0x6   : > { %p467_p4 = scmp.lt.s32.totalorder (!%p424_p3), %s1104_s29, 1  ;;  %s1117_s25 = smov (!%p424_p3), 64  }
   0x7   : > { %427 = sbr.rel (%p424_p3) target bundleno = 2228 (0x8b4), region = 76  ;;  %s1118_s26 = smov (!%p424_p3), 120  }
   0x8   : > { %s1119_s27 = smov (!%p424_p3), 72   ;;  %s1120_s28 = smov (!%p424_p3), 65  }
   0x9   : > { %s1121_s17 = smov (!%p424_p3), 127  }
   0xc   : > { %v516_v0 = vld [vmem:[%s1348_s3] sm:$0xff]  ;;  %v1114_v1 = vmov 0.0   ;;  %vm1115_vm0 = vmmov 0   ;;  %s1365_s29 = smov (!%p467_p4, %s1104_s29), 1  ;;  %v1116_v2 = vmov 0   ;;  %vm481_vm1 = vcmask 516096  }
   0xd   : > { %1012 = vmatprep.subr.bf16.mxu0 %v1114_v1  ;;  %1014 = vmatprep.mubr.msk.bf16.mxu0 %vm1115_vm0, %v1114_v1  ;;  %s996_s19 = sshll.u32 %s1365_s29, 3  ;;  %vm526_vm2 = vcmask 1043456   ;;  %v512_v10 = vld [vmem:[%s1347_s2] sm:$0xf]  ;;  %vm522_vm3 = vcmask 64512   ;;  %vm582_vm4 = vcmask 1048064   ;;  %v579_v31 = vlaneseq }
   0xe   : > { %1080 = vset.pattern.permute.xlu0 %v1116_v2  ;;  %1018 = vmatprep.subr.bf16.mxu1 %v1114_v1  ;;  %s1234_s22 = scalar_lea.vmem %s1345_s0, %s996_s19  ;;  %v647_v30 = vld [vmem:[%s1350_s5] sm:$0xff]  ;;  %vm639_vm14 = vcmask 523264  }
   0xf   : > { %519 = vperm.xlu0 %1080, %v516_v0   ;;  %1020 = vmatprep.mubr.msk.bf16.mxu1 %vm1115_vm0, %v1114_v1  ;;  %v484_v3 = vld [vmem:[%s1234_s22 + $0x4] sm:$0x1]  ;;  %v490_v4 = vld [vmem:[%s1234_s22 + $0x5] sm:$0x1]  ;;  %v496_v5 = vld [vmem:[%s1234_s22 + $0x6] sm:$0x1] }
  0x10   : > { %1081 = vset.pattern.permute.xlu1 %v1116_v2  ;;  %485 = vst.msk [vmem:[#allocation3] sm:$0x1] %vm481_vm1, %v484_v3  ;;  %486 = vst.msk [vmem:[#allocation3 + $0x1] sm:$0x1] %vm481_vm1, %v484_v3  ;;  %v502_v6 = vld [vmem:[%s1234_s22 + $0x7] sm:$0x1] }
  0x11   : > { %491 = vst.msk [vmem:[#allocation3 + $0x2] sm:$0x1] %vm481_vm1, %v490_v4  ;;  %492 = vst.msk [vmem:[#allocation3 + $0x3] sm:$0x1] %vm481_vm1, %v490_v4  ;;  %v507_v32 = vld [vmem:[%s1346_s1] sm:$0x3] }
  0x12   : > { %497 = vst.msk [vmem:[#allocation3 + $0x4] sm:$0x1] %vm481_vm1, %v496_v5  ;;  %498 = vst.msk [vmem:[#allocation3 + $0x5] sm:$0x1] %vm481_vm1, %v496_v5  ;;  %v580_v33 = vshrl.u32 %v579_v31, 7  ;;  %vm509_vm5 = vcmp.eq.s32.totalorder %v507_v32, 7 }
  0x13   : > { %503 = vst.msk [vmem:[#allocation3 + $0x6] sm:$0x1] %vm481_vm1, %v502_v6  ;;  %504 = vst.msk [vmem:[#allocation3 + $0x7] sm:$0x1] %vm481_vm1, %v502_v6  ;;  %vm508_vm6 = vcmp.eq.s32.totalorder %v507_v32, 0  ;;  %v601_v35 = vsel %vm509_vm5, 1, %v1116_v2 }
  0x14   : > { %v614_v34 = vsub.s32 0, %v580_v33  ;;  %v589_v36 = vsel %vm508_vm6, 1, %v1116_v2  ;;  %v592_v37 = vsub.s32 1, %v580_v33  ;;  %vm611_vm9 = vcmp.lt.s32.totalorder %v580_v33, 6  ;;  %v644_v56 = vld [vmem:[%s1349_s4] sm:$0xf] }
  0x15   : > { %vm600_vm12 = vcmp.lt.s32.totalorder %v580_v33, 4  ;;  %vm581_vm13 = vcmp.lt.s32.totalorder %v580_v33, 2  ;;  %v742_v0 = vld [vmem:[%s1354_s9] sm:$0xff] }
  0x16   : > { %v624_v38 = vrot.slane %v601_v35, %v614_v34  ;;  %v615_v39 = vrot.slane %v589_v36, %v614_v34  ;;  %v593_v40 = vrot.slane %v589_v36, %v592_v37  ;;  %v605_v41 = vrot.slane %v601_v35, %v592_v37  ;;  %v739_v37 = vld [vmem:[%s1353_s8] sm:$0xf] }
  0x18   : > { %vm625_vm7 = vcmp.eq.s32.totalorder %v624_v38, 1  ;;  %vm616_vm8 = vcmp.eq.s32.totalorder %v615_v39, 1  ;;  %vm594_vm10 = vcmp.eq.s32.totalorder %v593_v40, 1  ;;  %vm606_vm11 = vcmp.eq.s32.totalorder %v605_v41, 1 }
  0x1a   : > { %v1248_v7 = vld [vmem:[#allocation3] sm:$0xff] }
  0x1b   : > { %v513_v8 = vpack.c.bf16 %v1248_v7, %v1248_v7 }
  0x1d   : > { %v528_v9 = vsel %vm526_vm2, %v513_v8, 0 }
  0x1e   : > { %1013 = vmatpush3.bf16.msra.mxu0 %v528_v9 }
  0x1f   : > { %1024 = vmatprep.subr.bf16.mxu0 %v1114_v1 }
  0x21   : > { %1015 = vmatmul.mubr.msk.bf16.vlgmr.msra.gmra.mxu0 %vm522_vm3, %v512_v10 }
  0x22   : > { %1026 = vmatprep.mubr.msk.bf16.mxu0 %vm1115_vm0, %v1114_v1 }
  0x8a   : > { %v520_v11 = vpop.permute.xlu0 %519 }
  0xe1   : > { %v564_v12 = vpop.f32.mrf.mxu0 }
  0xe2   : > { %v565_v13 = vadd.f32 %v564_v12, %v520_v11 }
  0xe3   : > { %v1016_v14 = vpop.f32.mrf.mxu0 }
  0xe4   : > { %v571_v15 = vmul.f32 0.044715, %v565_v13  ;;  %v570_v23 = vmul.f32 0.5, %v565_v13  ;;  %v480_v14 = vld [vmem:[%s1234_s22] sm:$0x1] }
  0xe5   : > { %v567_v16 = vpop.f32.mrf.mxu0  ;;  %482 = vst.msk [vmem:[#allocation2] sm:$0x1] %vm481_vm1, %v480_v14  ;;  %483 = vst.msk [vmem:[#allocation2 + $0x1] sm:$0x1] %vm481_vm1, %v480_v14 }
  0xe6   : > { %v572_v17 = vmul.f32 %v571_v15, %v565_v13  ;;  %v487_v15 = vld [vmem:[%s1234_s22 + $0x1] sm:$0x1]  ;;  %v493_v16 = vld [vmem:[%s1234_s22 + $0x2] sm:$0x1] }
  0xe7   : > { %v1017_v18 = vpop.f32.mrf.mxu0  ;;  %488 = vst.msk [vmem:[#allocation2 + $0x2] sm:$0x1] %vm481_vm1, %v487_v15  ;;  %489 = vst.msk [vmem:[#allocation2 + $0x3] sm:$0x1] %vm481_vm1, %v487_v15 }
  0xe8   : > { %v573_v19 = vmul.f32 %v572_v17, %v565_v13  ;;  %494 = vst.msk [vmem:[#allocation2 + $0x4] sm:$0x1] %vm481_vm1, %v493_v16  ;;  %495 = vst.msk [vmem:[#allocation2 + $0x5] sm:$0x1] %vm481_vm1, %v493_v16  ;;  %v499_v17 = vld [vmem:[%s1234_s22 + $0x3] sm:$0x1] }
  0xe9   : > { %500 = vst.msk [vmem:[#allocation2 + $0x6] sm:$0x1] %vm481_vm1, %v499_v17  ;;  %501 = vst.msk [vmem:[#allocation2 + $0x7] sm:$0x1] %vm481_vm1, %v499_v17 }
  0xea   : > { %v574_v20 = vadd.f32 %v573_v19, %v565_v13  ;;  %v808_v13 = vld [vmem:[%s1356_s11] sm:$0xff] }
  0xec   : > { %v575_v21 = vmul.f32 0.7978846, %v574_v20 }
  0xee   : > { %1082 = vtanh.f32 %v575_v21 }
  0xf0   : > { %v505_v32 = vld [vmem:[#allocation2] sm:$0xff] }
  0xfb   : > { %v1083_v22 = vpop.eup %1082 }
  0xfc   : > { %v577_v24 = vadd.f32 1.0, %v1083_v22 }
  0xfe   : > { %v578_v25 = vmul.f32 %v577_v24, %v570_v23 }
 0x100   : > { %583 = vrot.lane.b32.xlu0 %v578_v25, %s1117_s25 }
 0x172   : > { %v584_v26 = vpop.permute.xlu0 %583 }
 0x173   : > { %v585_v27 = vsel %vm582_vm4, %v584_v26, %v578_v25 }
 0x174   : > { %586 = vrot.lane.b32.xlu1 %v585_v27, %s1117_s25  ;;  %v700_v27 = vld [vmem:[%s1351_s6] sm:$0xff] }
 0x1e6   : > { %v587_v28 = vpop.permute.xlu1 %586 }
 0x1e7   : > { %v588_v29 = vsel %vm582_vm4, %v587_v28, %v578_v25 }
 0x1e8   : > { %626 = vrot.lane.b32.xlu0 %v588_v29, %s1118_s26  ;;  %617 = vrot.lane.b32.xlu1 %v588_v29, %s1119_s27 }
 0x1ec   : > { %596 = vrot.lane.b32.xlu0 %v588_v29, %s1120_s28  ;;  %607 = vrot.lane.b32.xlu1 %v588_v29, %s1121_s17 }
 0x1f0   : > { %650 = vperm.xlu1 %1081, %v647_v30   ;;  %v702_v30 = vld [vmem:[%s1352_s7] sm:$0xff] }
 0x25a   : > { %v627_v42 = vpop.permute.xlu0 %626  ;;  %v618_v43 = vpop.permute.xlu1 %617 }
 0x25b   : > { %v629_v44 = vsel %vm625_vm7, %v578_v25, %v627_v42  ;;  %v620_v45 = vsel %vm616_vm8, %v578_v25, %v618_v43 }
 0x25c   : > { %v632_v48 = vsel %vm611_vm9, %v620_v45, %v629_v44 }
 0x25e   : > { %v597_v46 = vpop.permute.xlu0 %596  ;;  %v608_v47 = vpop.permute.xlu1 %607 }
 0x25f   : > { %v599_v49 = vsel %vm594_vm10, %v578_v25, %v597_v46  ;;  %v610_v50 = vsel %vm606_vm11, %v578_v25, %v608_v47 }
 0x260   : > { %v635_v51 = vsel %vm600_vm12, %v610_v50, %v632_v48 }
 0x261   : > { %v638_v52 = vsel %vm581_vm13, %v599_v49, %v635_v51 }
 0x262   : > { %640 = vst.msk [vmem:[#allocation4] sm:$0xff] %vm639_vm14, %v638_v52 }
 0x269   : > { %v641_v53 = vld [vmem:[#allocation4] sm:$0xff] }
 0x26a   : > { %v645_v54 = vpack.c.bf16 %v641_v53, %v641_v53 }
 0x26b   : > { %v651_v57 = vpop.permute.xlu1 %650 }
 0x26c   : > { %v657_v55 = vsel %vm526_vm2, %v645_v54, 0 }
 0x26d   : > { %1019 = vmatpush3.bf16.msra.mxu1 %v657_v55  ;;  %v805_v55 = vld [vmem:[%s1355_s10] sm:$0xf] }
 0x26e   : > { %1030 = vmatprep.subr.bf16.mxu1 %v1114_v1 }
 0x270   : > { %1021 = vmatmul.mubr.msk.bf16.vlgmr.msra.gmra.mxu1 %vm522_vm3, %v644_v56 }
 0x271   : > { %1032 = vmatprep.mubr.msk.bf16.mxu1 %vm1115_vm0, %v1114_v1 }
 0x330   : > { %v693_v58 = vpop.f32.mrf.mxu1 }
 0x331   : > { %v694_v59 = vadd.f32 %v693_v58, %v651_v57 }
 0x332   : > { %v1022_v60 = vpop.f32.mrf.mxu1 }
 0x333   : > { %v703_v61 = vsel %vm639_vm14, %v694_v59, 0.0 }
 0x334   : > { %v696_v62 = vpop.f32.mrf.mxu1  ;;  %704 = vadd.xlane.f32.xlu0 %v703_v61 }
 0x336   : > { %v1023_v63 = vpop.f32.mrf.mxu1 }
 0x34a   : > { %745 = vperm.xlu0 %1080, %v742_v0  }
 0x3bd   : > { %v705_v2 = vpop.xlane.xlu0 %704 }
 0x3be   : > { %v706_v3 = vrot.slane %v705_v2, 4 }
 0x3c0   : > { %v707_v4 = vadd.f32 %v706_v3, %v705_v2 }
 0x3c2   : > { %v708_v1 = vrot.slane %v707_v4, 2 }
 0x3c4   : > { %v709_v5 = vadd.f32 %v708_v1, %v707_v4 }
 0x3c5   : > { %v746_v38 = vpop.permute.xlu0 %745 }
 0x3c6   : > { %v710_v6 = vrot.slane %v709_v5, 1 }
 0x3c8   : > { %v711_v8 = vadd.f32 %v710_v6, %v709_v5 }
 0x3ca   : > { %1036 = vpush %v711_v8 }
 0x3fb   : > { %s1037_s28 = spop %1036 }
 0x3fc   : > { %s713_s17 = smul.f32 0.001953125, %s1037_s28 }
 0x3fe   : > { %v714_v9 = vstv %s713_s17 }
 0x3ff   : > { %v715_v10 = vsub.f32 %v694_v59, %v714_v9 }
 0x401   : > { %v716_v11 = vmul.f32 %v715_v10, %v715_v10 }
 0x403   : > { %v717_v12 = vsel %vm639_vm14, %v716_v11, 0.0 }
 0x404   : > { %718 = vadd.xlane.f32.xlu1 %v717_v12 }
 0x415   : > { %811 = vperm.xlu1 %1081, %v808_v13  }
 0x48d   : > { %v719_v18 = vpop.xlane.xlu1 %718 }
 0x48e   : > { %v720_v19 = vrot.slane %v719_v18, 4 }
 0x490   : > { %v721_v20 = vadd.f32 %v720_v19, %v719_v18 }
 0x491   : > { %v812_v56 = vpop.permute.xlu1 %811 }
 0x492   : > { %v722_v21 = vrot.slane %v721_v20, 2 }
 0x494   : > { %v723_v22 = vadd.f32 %v722_v21, %v721_v20  ;;  %v861_v20 = vld [vmem:[%s1357_s12] sm:$0xff] }
 0x496   : > { %v724_v23 = vrot.slane %v723_v22, 1 }
 0x498   : > { %v725_v24 = vadd.f32 %v724_v23, %v723_v22  ;;  %v863_v23 = vld [vmem:[%s1358_s13] sm:$0xff] }
 0x49a   : > { %1038 = vpush %v725_v24 }
 0x4cb   : > { %s1039_s21 = spop %1038 }
 0x4cc   : > { %s727_s23 = smul.f32 0.001953125, %s1039_s21 }
 0x4ce   : > { %s728_s24 = sadd.f32 1e-05, %s727_s23 }
 0x4d0   : > { %v729_v25 = vstv %s728_s24 }
 0x4d1   : > { %1084 = vrsqrt.f32 %v729_v25 }
 0x4de   : > { %v1085_v26 = vpop.eup %1084 }
 0x4df   : > { %1040 = vpush %v1085_v26 }
 0x510   : > { %s1041_s22 = spop %1040 }
 0x511   : > { %v732_v28 = vstv %s1041_s22 }
 0x512   : > { %v733_v29 = vmul.f32 %v732_v28, %v715_v10 }
 0x514   : > { %v734_v31 = vmul.f32 %v733_v29, %v700_v27 }
 0x516   : > { %v735_v33 = vadd.f32 %v734_v31, %v702_v30 }
 0x518   : > { %v1303_v34 = vadd.f32 %v735_v33, %v505_v32 }
 0x51a   : > { %898 = vst.msk [vmem:[#allocation2] sm:$0xff] %vm639_vm14, %v1303_v34  ;;  %v740_v35 = vpack.c.bf16 %v1303_v34, %v1303_v34 }
 0x51c   : > { %v752_v36 = vsel %vm526_vm2, %v740_v35, 0 }
 0x51d   : > { %1025 = vmatpush3.bf16.msra.mxu0 %v752_v36 }
 0x520   : > { %1027 = vmatmul.mubr.msk.bf16.vlgmr.msra.gmra.mxu0 %vm522_vm3, %v739_v37 }
 0x5e0   : > { %v788_v39 = vpop.f32.mrf.mxu0 }
 0x5e1   : > { %v789_v40 = vadd.f32 %v788_v39, %v746_v38 }
 0x5e2   : > { %v1028_v41 = vpop.f32.mrf.mxu0 }
 0x5e3   : > { %v795_v42 = vmul.f32 0.044715, %v789_v40  ;;  %v794_v50 = vmul.f32 0.5, %v789_v40 }
 0x5e4   : > { %v791_v43 = vpop.f32.mrf.mxu0 }
 0x5e5   : > { %v796_v44 = vmul.f32 %v795_v42, %v789_v40 }
 0x5e6   : > { %v1029_v45 = vpop.f32.mrf.mxu0 }
 0x5e7   : > { %v797_v46 = vmul.f32 %v796_v44, %v789_v40 }
 0x5e9   : > { %v798_v47 = vadd.f32 %v797_v46, %v789_v40 }
 0x5eb   : > { %v799_v48 = vmul.f32 0.7978846, %v798_v47 }
 0x5ed   : > { %1086 = vtanh.f32 %v799_v48 }
 0x5fa   : > { %v1087_v49 = vpop.eup %1086 }
 0x5fb   : > { %v801_v51 = vadd.f32 1.0, %v1087_v49 }
 0x5fd   : > { %v802_v52 = vmul.f32 %v801_v51, %v794_v50 }
 0x5ff   : > { %v806_v53 = vpack.c.bf16 %v802_v52, %v802_v52 }
 0x601   : > { %v818_v54 = vsel %vm526_vm2, %v806_v53, 0 }
 0x602   : > { %1031 = vmatpush3.bf16.msra.mxu1 %v818_v54 }
 0x605   : > { %1033 = vmatmul.mubr.msk.bf16.vlgmr.msra.gmra.mxu1 %vm522_vm3, %v805_v55 }
 0x6c5   : > { %v854_v57 = vpop.f32.mrf.mxu1 }
 0x6c6   : > { %v855_v58 = vadd.f32 %v854_v57, %v812_v56 }
 0x6c7   : > { %v1034_v59 = vpop.f32.mrf.mxu1 }
 0x6c8   : > { %v864_v60 = vsel %vm639_vm14, %v855_v58, 0.0 }
 0x6c9   : > { %865 = vadd.xlane.f32.xlu0 %v864_v60  ;;  %v857_v61 = vpop.f32.mrf.mxu1 }
 0x6cb   : > { %v1035_v62 = vpop.f32.mrf.mxu1 }
 0x752   : > { %v866_v63 = vpop.xlane.xlu0 %865 }
 0x753   : > { %v867_v0 = vrot.slane %v866_v63, 4 }
 0x755   : > { %v868_v2 = vadd.f32 %v867_v0, %v866_v63 }
 0x757   : > { %v869_v3 = vrot.slane %v868_v2, 2 }
 0x759   : > { %v870_v4 = vadd.f32 %v869_v3, %v868_v2 }
 0x75b   : > { %v871_v1 = vrot.slane %v870_v4, 1 }
 0x75d   : > { %v872_v5 = vadd.f32 %v871_v1, %v870_v4 }
 0x75f   : > { %1042 = vpush %v872_v5 }
 0x790   : > { %s1043_s23 = spop %1042 }
 0x791   : > { %s874_s24 = smul.f32 0.001953125, %s1043_s23 }
 0x793   : > { %v875_v6 = vstv %s874_s24  ;;  %s474_s24 = scalar_lea.vmem %s1359_s14, %s996_s19 }
 0x794   : > { %v876_v8 = vsub.f32 %v855_v58, %v875_v6 }
 0x796   : > { %v877_v9 = vmul.f32 %v876_v8, %v876_v8 }
 0x798   : > { %v878_v10 = vsel %vm639_vm14, %v877_v9, 0.0 }
 0x799   : > { %879 = vadd.xlane.f32.xlu1 %v878_v10 }
 0x822   : > { %v880_v11 = vpop.xlane.xlu1 %879 }
 0x823   : > { %v881_v12 = vrot.slane %v880_v11, 4 }
 0x825   : > { %v882_v13 = vadd.f32 %v881_v12, %v880_v11 }
 0x827   : > { %v883_v14 = vrot.slane %v882_v13, 2 }
 0x829   : > { %v884_v15 = vadd.f32 %v883_v14, %v882_v13 }
 0x82b   : > { %v885_v16 = vrot.slane %v884_v15, 1 }
 0x82d   : > { %v886_v17 = vadd.f32 %v885_v16, %v884_v15 }
 0x82f   : > { %1044 = vpush %v886_v17 }
 0x860   : > { %s1045_s22 = spop %1044 }
 0x861   : > { %s888_s25 = smul.f32 0.001953125, %s1045_s22 }
 0x863   : > { %s889_s26 = sadd.f32 1e-05, %s888_s25 }
 0x865   : > { %v890_v18 = vstv %s889_s26 }
 0x866   : > { %1088 = vrsqrt.f32 %v890_v18 }
 0x873   : > { %v1089_v19 = vpop.eup %1088 }
 0x874   : > { %1046 = vpush %v1089_v19 }
 0x8a5   : > { %s1047_s27 = spop %1046 }
 0x8a6   : > { %v893_v21 = vstv %s1047_s27 }
 0x8a7   : > { %v894_v22 = vmul.f32 %v893_v21, %v876_v8 }
 0x8a9   : > { %v895_v24 = vmul.f32 %v894_v22, %v861_v20 }
 0x8ab   : > { %v896_v25 = vadd.f32 %v895_v24, %v863_v23 }
 0x8ad   : > { %v897_v26 = vadd.f32 %v896_v25, %v1248_v7 }
 0x8af   : > { %899 = vst.msk [vmem:[#allocation3] sm:$0xff] %vm639_vm14, %v897_v26  ;;  %v903_v27 = vadd.f32 %v897_v26, %v1303_v34 }
 0x8b1   : > { %v904_v28 = vmul.f32 0.5, %v903_v27 }
 0x8b3   : > { %905 = vst.msk [vmem:[%s474_s24] sm:$0xff] %vm639_vm14, %v904_v28 }
 0x8b4 PF: > { %s24_s15 = sadd.s32 1, %s1112_s15   ;;  %s1360_s29 = smov %s1108_s30 }
 0x8b5   : > { %p21_p5 = scmp.ge.s32.totalorder %s24_s15, 4   ;;  %s1361_s30 = smov %s1363_s16 }
 0x8b7   :  { %23 = sbr.rel (!%p21_p5) target bundleno = 2 (0x2), region = 126 }

</bundles_post_ra>
